<compile_context>
chip_gen: v7x
topology: tpu7x:2x2x1
jax: 0.10.0
libtpu: 0.0.40
codegen_flags: <defaults>
</compile_context>

<pallas_src>
import functools

import jax
import jax.numpy as jnp
from jax import lax
from jax.experimental import pallas as pl
from jax.experimental.pallas import tpu as pltpu

# The image interior is stored at (sublane, lane) offset (8, 128) inside the
# halo scratch so the interior store is tile-aligned (unmasked); the 1-px halo
# ring around it stays zero and provides SAME (pad=1) boundary conditions for
# the 3x3 sobel windows.
_ROW_OFF = 8
_COL_OFF = 128
# TODO(synk): when W is a multiple of 128 the column halo pads the scratch by a
# full extra lane tile; a pltpu.roll + edge-mask lane-shift sobel variant would
# remove it (most valuable on v7x's 64 MiB VMEM).


def _fusion_kernel(fus_ref, a_ref, b_ref, out_ref, ypad_ref, cache_ref, *, H, W):
    """One grid cell = (one batch tile) x (one fusion image).

    fus_ref  : (1, TB, 3, H, W)   fusion-image block
    a_ref    : (TB, 3, H, W)      image A block (resident across the inner f axis)
    b_ref    : (TB, 3, H, W)      image B block (resident across the inner f axis)
    out_ref  : (1, 1, 8, 128)     lane-dense partial-sum tile (rows 0..4 used)
    ypad_ref : (TB, H+9, W+129)   zero-halo scratch for the 3x3 sobel windows
    cache_ref: (5, TB, H, W)      A/B-derived planes, filled once per batch tile:
                                  [0]=Y_joint [1]=Cb_B [2]=Cr_B [3]=grad_A [4]=grad_joint
    """
    f = pl.program_id(1)

    def rgb2ycbcr(x):
        r = x[:, 0, :, :]
        g = x[:, 1, :, :]
        b = x[:, 2, :, :]
        y = 0.299 * r + 0.587 * g + 0.114 * b
        cr = jnp.clip((r - y) * 0.713 + 0.5, 0.0, 1.0)
        cb = jnp.clip((b - y) * 0.564 + 0.5, 0.0, 1.0)
        return jnp.clip(y, 0.0, 1.0), cb, cr

    def sobel(y):
        # 'SAME' (pad=1) 3x3 sobel via shifted windows of the zero-halo scratch.
        # Only the interior is written; the halo ring stays zero for every call.
        ypad_ref[:, _ROW_OFF:_ROW_OFF + H, _COL_OFF:_COL_OFF + W] = y
        yp = ypad_ref[...]

        def win(ki, kj):
            r0 = _ROW_OFF - 1 + ki
            c0 = _COL_OFF - 1 + kj
            return yp[:, r0:r0 + H, c0:c0 + W]

        w00 = win(0, 0); w01 = win(0, 1); w02 = win(0, 2)
        w10 = win(1, 0);                  w12 = win(1, 2)
        w20 = win(2, 0); w21 = win(2, 1); w22 = win(2, 2)
        gx = (w02 - w00) + 2.0 * (w12 - w10) + (w22 - w20)  # [[-1,0,1],[-2,0,2],[-1,0,1]]
        gy = (w00 - w20) + 2.0 * (w01 - w21) + (w02 - w22)  # [[1,2,1],[0,0,0],[-1,-2,-1]]
        return jnp.abs(gx) + jnp.abs(gy)                    # already >= 0

    # ---- once per batch tile (first fusion image): halo zero + A/B cache ----
    @pl.when(f == 0)
    def _():
        # Zero the whole halo scratch once per batch tile; all later sobel calls
        # only rewrite the interior, so the halo ring stays zero for every f.
        ypad_ref[...] = jnp.zeros(ypad_ref.shape, jnp.float32)
        ya, _, _ = rgb2ycbcr(a_ref[...].astype(jnp.float32))
        yb, cbb, crb = rgb2ycbcr(b_ref[...].astype(jnp.float32))
        cache_ref[0] = jnp.maximum(ya, yb)      # Y_joint
        cache_ref[1] = cbb                      # Cb_B
        cache_ref[2] = crb                      # Cr_B
        ga = sobel(ya)
        gb = sobel(yb)
        cache_ref[3] = ga                       # grad_A
        cache_ref[4] = jnp.maximum(ga, gb)      # grad_joint

    # ---- every grid step: fusion-image terms against the cached planes ----
    yf, cbf, crf = rgb2ycbcr(fus_ref[0].astype(jnp.float32))

    # Intensity / color sums first so the chroma temporaries die before sobel.
    s_int = jnp.sum(jnp.abs(yf - cache_ref[0]))   # L1 sum: Y_fusion vs Y_joint
    s_cb = jnp.sum(jnp.abs(cbf - cache_ref[1]))   # L1 sum: Cb_fusion vs Cb_B
    s_cr = jnp.sum(jnp.abs(crf - cache_ref[2]))   # L1 sum: Cr_fusion vs Cr_B

    gf = sobel(yf)
    s_gj = jnp.sum(jnp.abs(gf - cache_ref[4]))    # L1 sum: grad_fusion vs grad_joint
    s_ga = jnp.sum(jnp.abs(gf - cache_ref[3]))    # L1 sum: grad_fusion vs grad_A

    rows = lax.broadcasted_iota(jnp.int32, (8, 128), 0)
    tile = jnp.where(rows == 0, s_int, jnp.float32(0.0))
    tile = jnp.where(rows == 1, s_cb, tile)
    tile = jnp.where(rows == 2, s_cr, tile)
    tile = jnp.where(rows == 3, s_gj, tile)
    tile = jnp.where(rows == 4, s_ga, tile)
    out_ref[0, 0] = tile


def _round_up(x, m):
    return -(-x // m) * m


def _pick_batch_tile(batch, H, W, in_itemsize):
    """Generation- and pipeline-aware batch-tile size + matching VMEM limit."""
    try:
        vmem_cap = int(pltpu.get_tpu_info().vmem_capacity_bytes)
    except Exception:
        vmem_cap = 64 * 1024 * 1024        # conservative (v7x-sized) fallback

    plane = _round_up(H, 8) * _round_up(W, 128)             # rounded (H,W) plane
    img_block = 3 * plane * in_itemsize                     # one (3,H,W) image block
    pipeline = 2 * 3 * img_block                            # fus/A/B blocks, double-buffered
    scratch = _round_up(H + _ROW_OFF + 1, 8) * _round_up(W + _COL_OFF + 1, 128) * 4
    cache = 5 * plane * 4                                   # cached A/B planes (f32)
    temps = 12 * plane * 4                                  # live f32 temporaries (rough)
    per_b = pipeline + scratch + cache + temps

    budget = (vmem_cap * 3) // 4
    tb = int(max(1, min(batch, budget // max(per_b, 1))))
    # Prefer >=2 batch tiles so both v7x TensorCores get a parallel slice
    # (measured no-op on single-core v5e/v6e).
    if batch >= 2:
        tb = min(tb, batch // 2)
    tb = max(tb, 1)
    while batch % tb:
        tb -= 1
    # TODO(synk): if even TB=1 exceeds the budget (very large images, esp. on
    # v7x's 64 MiB VMEM), add H-tiling with a 2-row overlapping halo via
    # overlapping-row index_maps instead of zero padding at tile seams.

    vmem_limit = int(min(budget, max(32 * 1024 * 1024, per_b * tb + (16 << 20))))
    return tb, vmem_limit


def fusion_loss(imgs_fusion, img_A, img_B, weights):
    """Pallas equivalent of Fusion_loss.forward(imgs_fusion, img_A, img_B, weights)."""
    # Stack in the native dtype; the kernel upcasts to f32 after the block DMA.
    fus = jnp.stack(list(imgs_fusion), axis=0)
    num_f, batch, chans, H, W = fus.shape
    assert chans == 3, "Fusion_loss expects RGB inputs"

    itemsize = max(jnp.dtype(fus.dtype).itemsize,
                   jnp.dtype(img_A.dtype).itemsize,
                   jnp.dtype(img_B.dtype).itemsize)
    tb, vmem_limit = _pick_batch_tile(batch, H, W, itemsize)
    nb = batch // tb

    kernel = functools.partial(_fusion_kernel, H=H, W=W)
    partials = pl.pallas_call(
        kernel,
        out_shape=jax.ShapeDtypeStruct((nb, num_f, 8, 128), jnp.float32),
        grid_spec=pltpu.PrefetchScalarGridSpec(
            num_scalar_prefetch=0,
            grid=(nb, num_f),                 # batch tiles outer, fusion images inner
            in_specs=[
                pl.BlockSpec((1, tb, 3, H, W), lambda b, f: (f, b, 0, 0, 0)),
                pl.BlockSpec((tb, 3, H, W), lambda b, f: (b, 0, 0, 0)),
                pl.BlockSpec((tb, 3, H, W), lambda b, f: (b, 0, 0, 0)),
            ],
            out_specs=pl.BlockSpec((1, 1, 8, 128), lambda b, f: (b, f, 0, 0)),
            scratch_shapes=[
                pltpu.VMEM((tb, H + _ROW_OFF + 1, W + _COL_OFF + 1), jnp.float32),
                pltpu.VMEM((5, tb, H, W), jnp.float32),
            ],
        ),
        compiler_params=pltpu.CompilerParams(
            # f axis must be sequential ("arbitrary") so the A/B cache filled at
            # f==0 is valid for every later fusion image of the same batch tile.
            dimension_semantics=("parallel", "arbitrary"),
            vmem_limit_bytes=vmem_limit),
    )(fus, img_A, img_B)

    # Rows 0..4 of each (8,128) tile hold the five L1 partial sums.
    sums = jnp.sum(partials[:, :, :5, 0], axis=0)          # (F, 5)
    count = jnp.float32(batch * H * W)                     # L1 mean over (B,1,H,W)
    m_int, m_cb, m_cr, m_gj, m_ga = [sums[:, i] / count for i in range(5)]

    w = jnp.asarray(weights, jnp.float32)                  # per-image scalar weights
    li = w * (20.0 * m_int)                                # loss_intensity per image
    lc = 100.0 * w * (m_cb + m_cr)                         # loss_color per image
    lg_cum = jnp.cumsum(w * (m_gj + 2.0 * m_ga))           # running loss_grad
    loss_fusion = jnp.sum(li + lc + 20.0 * lg_cum)         # += li + lc + 20*loss_grad

    return {
        'loss_intensity': li[-1],
        'loss_color': lc[-1],
        'loss_grad': lg_cum[-1],
        'loss_fusion': loss_fusion,
    }


# -------------------- pure-JAX reference (for verification) --------------------
def _reference_fusion_loss(imgs_fusion, img_A, img_B, weights):
    kx = jnp.array([[-1., 0., 1.], [-2., 0., 2.], [-1., 0., 1.]],
                   jnp.float32).reshape(1, 1, 3, 3)
    ky = jnp.array([[1., 2., 1.], [0., 0., 0.], [-1., -2., -1.]],
                   jnp.float32).reshape(1, 1, 3, 3)
    dn = ('NCHW', 'OIHW', 'NCHW')

    def sobel(x):
        sx = lax.conv_general_dilated(x, kx, (1, 1), 'SAME', dimension_numbers=dn)
        sy = lax.conv_general_dilated(x, ky, (1, 1), 'SAME', dimension_numbers=dn)
        return jnp.abs(sx) + jnp.abs(sy)

    def rgb2ycrcb(img):
        R = img[:, 0:1]; G = img[:, 1:2]; B = img[:, 2:3]
        Y = 0.299 * R + 0.587 * G + 0.114 * B
        Cr = (R - Y) * 0.713 + 0.5
        Cb = (B - Y) * 0.564 + 0.5
        return (jnp.clip(Y, 0.0, 1.0), jnp.clip(Cb, 0.0, 1.0), jnp.clip(Cr, 0.0, 1.0))

    l1 = lambda a, b: jnp.mean(jnp.abs(a - b))
    loss_intensity = jnp.float32(0.0)
    loss_color = jnp.float32(0.0)
    loss_grad = jnp.float32(0.0)
    loss_fusion = jnp.float32(0.0)
    for img_f, wgt in zip(imgs_fusion, weights):
        Yf, Cbf, Crf = rgb2ycrcb(img_f.astype(jnp.float32))
        Ya, _, _ = rgb2ycrcb(img_A.astype(jnp.float32))
        Yb, Cbb, Crb = rgb2ycrcb(img_B.astype(jnp.float32))
        Yj = jnp.maximum(Ya, Yb)
        loss_intensity = wgt * (20.0 * l1(Yf, Yj) + 0.0 * l1(Yf, Ya) + 0.0 * l1(Yf, Yb))
        loss_color = 100.0 * wgt * (l1(Cbf, Cbb) + l1(Crf, Crb))
        ga = sobel(Ya); gb = sobel(Yb); gf = sobel(Yf)
        gj = jnp.maximum(ga, gb)
        loss_grad = loss_grad + wgt * (l1(gf, gj) + 2.0 * l1(gf, ga))
        loss_fusion = loss_fusion + loss_intensity + loss_color + 20.0 * loss_grad
    return {'loss_intensity': loss_intensity, 'loss_color': loss_color,
            'loss_grad': loss_grad, 'loss_fusion': loss_fusion}


if __name__ == "__main__":
    key = jax.random.PRNGKey(0)
    k1, k2, k3, k4 = jax.random.split(key, 4)

    B, C, H, W = 2, 3, 16, 16
    img_A = jax.random.uniform(k1, (B, C, H, W), jnp.float32)
    img_B = jax.random.uniform(k2, (B, C, H, W), jnp.float32)
    imgs_fusion = [jax.random.uniform(k3, (B, C, H, W), jnp.float32),
                   jax.random.uniform(k4, (B, C, H, W), jnp.float32)]
    weights = [0.5, 1.0]

    out = fusion_loss(imgs_fusion, img_A, img_B, weights)
    out = jax.tree_util.tree_map(lambda x: jax.block_until_ready(x), out)
    ref = _reference_fusion_loss(imgs_fusion, img_A, img_B, weights)
    ref = jax.tree_util.tree_map(lambda x: jax.block_until_ready(x), ref)

    for name in ('loss_intensity', 'loss_color', 'loss_grad', 'loss_fusion'):
        assert jnp.allclose(out[name], ref[name], rtol=1e-4, atol=1e-4), (
            name, out[name], ref[name])

    print("KERNEL_OK")
</pallas_src>

<mosaic_0001>
module attributes {stable_mosaic.version = 11 : i64} {
  func.func @_fusion_kernel(%arg0: i32, %arg1: i32, %arg2: memref<1x1x3x16x16xf32, #tpu.memory_space<vmem>>, %arg3: memref<1x3x16x16xf32, #tpu.memory_space<vmem>>, %arg4: memref<1x3x16x16xf32, #tpu.memory_space<vmem>>, %arg5: memref<1x1x8x128xf32, #tpu.memory_space<vmem>>, %arg6: memref<1x25x145xf32, #tpu.memory_space<vmem>>, %arg7: memref<5x1x16x16xf32, #tpu.memory_space<vmem>>) attributes {dimension_semantics = [#tpu.dimension_semantics<parallel>, #tpu.dimension_semantics<arbitrary>], iteration_bounds = array<i64: 2, 2>, scalar_prefetch = 0 : i64, scratch_operands = 2 : i64, tpu.core_type = #tpu.core_type<tc>, window_params = [{transform_indices = @transform_0, window_bounds = array<i64: 1, 1, 3, 16, 16>}, {transform_indices = @transform_1, window_bounds = array<i64: 1, 3, 16, 16>}, {transform_indices = @transform_2, window_bounds = array<i64: 1, 3, 16, 16>}, {transform_indices = @transform_3, window_bounds = array<i64: 1, 1, 8, 128>}]} {
    %c0_i32 = arith.constant 0 : i32
    %0 = arith.cmpi eq, %arg1, %c0_i32 : i32
    %1 = arith.extui %0 : i1 to i32
    %c0_i32_0 = arith.constant 0 : i32
    %2 = arith.cmpi ne, %1, %c0_i32_0 : i32
    scf.if %2 {
      %cst_50 = arith.constant 0.000000e+00 : f32
      %133 = vector.broadcast %cst_50 : f32 to vector<1x25x145xf32>
      %c0_51 = arith.constant 0 : index
      %c0_52 = arith.constant 0 : index
      %c0_53 = arith.constant 0 : index
      %134 = vector.load %arg6[%c0_51, %c0_52, %c0_53] : memref<1x25x145xf32, #tpu.memory_space<vmem>>, vector<1x25x145xf32>
      tpu.vector_store %arg6[%c0_51, %c0_52, %c0_53], %133 {strides = array<i32>} : memref<1x25x145xf32, #tpu.memory_space<vmem>>, vector<1x25x145xf32>,
      %c0_54 = arith.constant 0 : index
      %c0_55 = arith.constant 0 : index
      %c0_56 = arith.constant 0 : index
      %c0_57 = arith.constant 0 : index
      %135 = vector.load %arg3[%c0_54, %c0_55, %c0_56, %c0_57] : memref<1x3x16x16xf32, #tpu.memory_space<vmem>>, vector<1x3x16x16xf32>
      %136 = vector.extract_strided_slice %135 {offsets = [0, 0, 0, 0], sizes = [1, 1, 16, 16], strides = [1, 1, 1, 1]} : vector<1x3x16x16xf32> to vector<1x1x16x16xf32>
      %137 = vector.shape_cast %136 : vector<1x1x16x16xf32> to vector<1x16x16xf32>
      %138 = vector.extract_strided_slice %135 {offsets = [0, 1, 0, 0], sizes = [1, 1, 16, 16], strides = [1, 1, 1, 1]} : vector<1x3x16x16xf32> to vector<1x1x16x16xf32>
      %139 = vector.shape_cast %138 : vector<1x1x16x16xf32> to vector<1x16x16xf32>
      %140 = vector.extract_strided_slice %135 {offsets = [0, 2, 0, 0], sizes = [1, 1, 16, 16], strides = [1, 1, 1, 1]} : vector<1x3x16x16xf32> to vector<1x1x16x16xf32>
      %141 = vector.shape_cast %140 : vector<1x1x16x16xf32> to vector<1x16x16xf32>
      %cst_58 = arith.constant 2.990000e-01 : f32
      %142 = vector.broadcast %cst_58 : f32 to vector<1x16x16xf32>
      %143 = arith.mulf %142, %137 : vector<1x16x16xf32>
      %cst_59 = arith.constant 5.870000e-01 : f32
      %144 = vector.broadcast %cst_59 : f32 to vector<1x16x16xf32>
      %145 = arith.mulf %144, %139 : vector<1x16x16xf32>
      %146 = arith.addf %143, %145 : vector<1x16x16xf32>
      %cst_60 = arith.constant 1.140000e-01 : f32
      %147 = vector.broadcast %cst_60 : f32 to vector<1x16x16xf32>
      %148 = arith.mulf %147, %141 : vector<1x16x16xf32>
      %149 = arith.addf %146, %148 : vector<1x16x16xf32>
      %cst_61 = arith.constant 0.000000e+00 : f32
      %cst_62 = arith.constant 1.000000e+00 : f32
      %150 = vector.broadcast %cst_61 : f32 to vector<1x16x16xf32>
      %151 = arith.maximumf %150, %149 : vector<1x16x16xf32>
      %152 = vector.broadcast %cst_62 : f32 to vector<1x16x16xf32>
      %153 = arith.minimumf %152, %151 : vector<1x16x16xf32>
      %c0_63 = arith.constant 0 : index
      %c0_64 = arith.constant 0 : index
      %c0_65 = arith.constant 0 : index
      %c0_66 = arith.constant 0 : index
      %154 = vector.load %arg4[%c0_63, %c0_64, %c0_65, %c0_66] : memref<1x3x16x16xf32, #tpu.memory_space<vmem>>, vector<1x3x16x16xf32>
      %155 = vector.extract_strided_slice %154 {offsets = [0, 0, 0, 0], sizes = [1, 1, 16, 16], strides = [1, 1, 1, 1]} : vector<1x3x16x16xf32> to vector<1x1x16x16xf32>
      %156 = vector.shape_cast %155 : vector<1x1x16x16xf32> to vector<1x16x16xf32>
      %157 = vector.extract_strided_slice %154 {offsets = [0, 1, 0, 0], sizes = [1, 1, 16, 16], strides = [1, 1, 1, 1]} : vector<1x3x16x16xf32> to vector<1x1x16x16xf32>
      %158 = vector.shape_cast %157 : vector<1x1x16x16xf32> to vector<1x16x16xf32>
      %159 = vector.extract_strided_slice %154 {offsets = [0, 2, 0, 0], sizes = [1, 1, 16, 16], strides = [1, 1, 1, 1]} : vector<1x3x16x16xf32> to vector<1x1x16x16xf32>
      %160 = vector.shape_cast %159 : vector<1x1x16x16xf32> to vector<1x16x16xf32>
      %cst_67 = arith.constant 2.990000e-01 : f32
      %161 = vector.broadcast %cst_67 : f32 to vector<1x16x16xf32>
      %162 = arith.mulf %161, %156 : vector<1x16x16xf32>
      %cst_68 = arith.constant 5.870000e-01 : f32
      %163 = vector.broadcast %cst_68 : f32 to vector<1x16x16xf32>
      %164 = arith.mulf %163, %158 : vector<1x16x16xf32>
      %165 = arith.addf %162, %164 : vector<1x16x16xf32>
      %cst_69 = arith.constant 1.140000e-01 : f32
      %166 = vector.broadcast %cst_69 : f32 to vector<1x16x16xf32>
      %167 = arith.mulf %166, %160 : vector<1x16x16xf32>
      %168 = arith.addf %165, %167 : vector<1x16x16xf32>
      %169 = arith.subf %156, %168 : vector<1x16x16xf32>
      %cst_70 = arith.constant 0.712999999 : f32
      %170 = vector.broadcast %cst_70 : f32 to vector<1x16x16xf32>
      %171 = arith.mulf %169, %170 : vector<1x16x16xf32>
      %cst_71 = arith.constant 5.000000e-01 : f32
      %172 = vector.broadcast %cst_71 : f32 to vector<1x16x16xf32>
      %173 = arith.addf %171, %172 : vector<1x16x16xf32>
      %cst_72 = arith.constant 0.000000e+00 : f32
      %cst_73 = arith.constant 1.000000e+00 : f32
      %174 = vector.broadcast %cst_72 : f32 to vector<1x16x16xf32>
      %175 = arith.maximumf %174, %173 : vector<1x16x16xf32>
      %176 = vector.broadcast %cst_73 : f32 to vector<1x16x16xf32>
      %177 = arith.minimumf %176, %175 : vector<1x16x16xf32>
      %178 = arith.subf %160, %168 : vector<1x16x16xf32>
      %cst_74 = arith.constant 5.640000e-01 : f32
      %179 = vector.broadcast %cst_74 : f32 to vector<1x16x16xf32>
      %180 = arith.mulf %178, %179 : vector<1x16x16xf32>
      %cst_75 = arith.constant 5.000000e-01 : f32
      %181 = vector.broadcast %cst_75 : f32 to vector<1x16x16xf32>
      %182 = arith.addf %180, %181 : vector<1x16x16xf32>
      %cst_76 = arith.constant 0.000000e+00 : f32
      %cst_77 = arith.constant 1.000000e+00 : f32
      %183 = vector.broadcast %cst_76 : f32 to vector<1x16x16xf32>
      %184 = arith.maximumf %183, %182 : vector<1x16x16xf32>
      %185 = vector.broadcast %cst_77 : f32 to vector<1x16x16xf32>
      %186 = arith.minimumf %185, %184 : vector<1x16x16xf32>
      %cst_78 = arith.constant 0.000000e+00 : f32
      %cst_79 = arith.constant 1.000000e+00 : f32
      %187 = vector.broadcast %cst_78 : f32 to vector<1x16x16xf32>
      %188 = arith.maximumf %187, %168 : vector<1x16x16xf32>
      %189 = vector.broadcast %cst_79 : f32 to vector<1x16x16xf32>
      %190 = arith.minimumf %189, %188 : vector<1x16x16xf32>
      %191 = arith.maximumf %153, %190 : vector<1x16x16xf32>
      %c0_80 = arith.constant 0 : index
      %c0_81 = arith.constant 0 : index
      %c0_82 = arith.constant 0 : index
      %c0_83 = arith.constant 0 : index
      %192 = vector.load %arg7[%c0_80, %c0_81, %c0_82, %c0_83] : memref<5x1x16x16xf32, #tpu.memory_space<vmem>>, vector<1x1x16x16xf32>
      %193 = vector.shape_cast %192 : vector<1x1x16x16xf32> to vector<1x16x16xf32>
      %194 = vector.shape_cast %191 : vector<1x16x16xf32> to vector<1x1x16x16xf32>
      tpu.vector_store %arg7[%c0_80, %c0_81, %c0_82, %c0_83], %194 {strides = array<i32>} : memref<5x1x16x16xf32, #tpu.memory_space<vmem>>, vector<1x1x16x16xf32>,
      %c1_84 = arith.constant 1 : index
      %c0_85 = arith.constant 0 : index
      %c0_86 = arith.constant 0 : index
      %c0_87 = arith.constant 0 : index
      %195 = vector.load %arg7[%c1_84, %c0_85, %c0_86, %c0_87] : memref<5x1x16x16xf32, #tpu.memory_space<vmem>>, vector<1x1x16x16xf32>
      %196 = vector.shape_cast %195 : vector<1x1x16x16xf32> to vector<1x16x16xf32>
      %197 = vector.shape_cast %186 : vector<1x16x16xf32> to vector<1x1x16x16xf32>
      tpu.vector_store %arg7[%c1_84, %c0_85, %c0_86, %c0_87], %197 {strides = array<i32>} : memref<5x1x16x16xf32, #tpu.memory_space<vmem>>, vector<1x1x16x16xf32>,
      %c2_88 = arith.constant 2 : index
      %c0_89 = arith.constant 0 : index
      %c0_90 = arith.constant 0 : index
      %c0_91 = arith.constant 0 : index
      %198 = vector.load %arg7[%c2_88, %c0_89, %c0_90, %c0_91] : memref<5x1x16x16xf32, #tpu.memory_space<vmem>>, vector<1x1x16x16xf32>
      %199 = vector.shape_cast %198 : vector<1x1x16x16xf32> to vector<1x16x16xf32>
      %200 = vector.shape_cast %177 : vector<1x16x16xf32> to vector<1x1x16x16xf32>
      tpu.vector_store %arg7[%c2_88, %c0_89, %c0_90, %c0_91], %200 {strides = array<i32>} : memref<5x1x16x16xf32, #tpu.memory_space<vmem>>, vector<1x1x16x16xf32>,
      %c0_92 = arith.constant 0 : index
      %c8_93 = arith.constant 8 : index
      %c128_94 = arith.constant 128 : index
      %201 = vector.load %arg6[%c0_92, %c8_93, %c128_94] : memref<1x25x145xf32, #tpu.memory_space<vmem>>, vector<1x16x16xf32>
      tpu.vector_store %arg6[%c0_92, %c8_93, %c128_94], %153 {strides = array<i32>} : memref<1x25x145xf32, #tpu.memory_space<vmem>>, vector<1x16x16xf32>,
      %c0_95 = arith.constant 0 : index
      %c0_96 = arith.constant 0 : index
      %c0_97 = arith.constant 0 : index
      %202 = vector.load %arg6[%c0_95, %c0_96, %c0_97] : memref<1x25x145xf32, #tpu.memory_space<vmem>>, vector<1x25x145xf32>
      %203 = vector.extract_strided_slice %202 {offsets = [0, 7, 127], sizes = [1, 16, 16], strides = [1, 1, 1]} : vector<1x25x145xf32> to vector<1x16x16xf32>
      %204 = vector.extract_strided_slice %202 {offsets = [0, 7, 128], sizes = [1, 16, 16], strides = [1, 1, 1]} : vector<1x25x145xf32> to vector<1x16x16xf32>
      %205 = vector.extract_strided_slice %202 {offsets = [0, 7, 129], sizes = [1, 16, 16], strides = [1, 1, 1]} : vector<1x25x145xf32> to vector<1x16x16xf32>
      %206 = vector.extract_strided_slice %202 {offsets = [0, 8, 127], sizes = [1, 16, 16], strides = [1, 1, 1]} : vector<1x25x145xf32> to vector<1x16x16xf32>
      %207 = vector.extract_strided_slice %202 {offsets = [0, 8, 129], sizes = [1, 16, 16], strides = [1, 1, 1]} : vector<1x25x145xf32> to vector<1x16x16xf32>
      %208 = vector.extract_strided_slice %202 {offsets = [0, 9, 127], sizes = [1, 16, 16], strides = [1, 1, 1]} : vector<1x25x145xf32> to vector<1x16x16xf32>
      %209 = vector.extract_strided_slice %202 {offsets = [0, 9, 128], sizes = [1, 16, 16], strides = [1, 1, 1]} : vector<1x25x145xf32> to vector<1x16x16xf32>
      %210 = vector.extract_strided_slice %202 {offsets = [0, 9, 129], sizes = [1, 16, 16], strides = [1, 1, 1]} : vector<1x25x145xf32> to vector<1x16x16xf32>
      %211 = arith.subf %205, %203 : vector<1x16x16xf32>
      %212 = arith.subf %207, %206 : vector<1x16x16xf32>
      %cst_98 = arith.constant 2.000000e+00 : f32
      %213 = vector.broadcast %cst_98 : f32 to vector<1x16x16xf32>
      %214 = arith.mulf %213, %212 : vector<1x16x16xf32>
      %215 = arith.addf %211, %214 : vector<1x16x16xf32>
      %216 = arith.subf %210, %208 : vector<1x16x16xf32>
      %217 = arith.addf %215, %216 : vector<1x16x16xf32>
      %218 = arith.subf %203, %208 : vector<1x16x16xf32>
      %219 = arith.subf %204, %209 : vector<1x16x16xf32>
      %cst_99 = arith.constant 2.000000e+00 : f32
      %220 = vector.broadcast %cst_99 : f32 to vector<1x16x16xf32>
      %221 = arith.mulf %220, %219 : vector<1x16x16xf32>
      %222 = arith.addf %218, %221 : vector<1x16x16xf32>
      %223 = arith.subf %205, %210 : vector<1x16x16xf32>
      %224 = arith.addf %222, %223 : vector<1x16x16xf32>
      %225 = math.absf %217 : vector<1x16x16xf32>
      %226 = math.absf %224 : vector<1x16x16xf32>
      %227 = arith.addf %225, %226 : vector<1x16x16xf32>
      %c0_100 = arith.constant 0 : index
      %c8_101 = arith.constant 8 : index
      %c128_102 = arith.constant 128 : index
      %228 = vector.load %arg6[%c0_100, %c8_101, %c128_102] : memref<1x25x145xf32, #tpu.memory_space<vmem>>, vector<1x16x16xf32>
      tpu.vector_store %arg6[%c0_100, %c8_101, %c128_102], %190 {strides = array<i32>} : memref<1x25x145xf32, #tpu.memory_space<vmem>>, vector<1x16x16xf32>,
      %c0_103 = arith.constant 0 : index
      %c0_104 = arith.constant 0 : index
      %c0_105 = arith.constant 0 : index
      %229 = vector.load %arg6[%c0_103, %c0_104, %c0_105] : memref<1x25x145xf32, #tpu.memory_space<vmem>>, vector<1x25x145xf32>
      %230 = vector.extract_strided_slice %229 {offsets = [0, 7, 127], sizes = [1, 16, 16], strides = [1, 1, 1]} : vector<1x25x145xf32> to vector<1x16x16xf32>
      %231 = vector.extract_strided_slice %229 {offsets = [0, 7, 128], sizes = [1, 16, 16], strides = [1, 1, 1]} : vector<1x25x145xf32> to vector<1x16x16xf32>
      %232 = vector.extract_strided_slice %229 {offsets = [0, 7, 129], sizes = [1, 16, 16], strides = [1, 1, 1]} : vector<1x25x145xf32> to vector<1x16x16xf32>
      %233 = vector.extract_strided_slice %229 {offsets = [0, 8, 127], sizes = [1, 16, 16], strides = [1, 1, 1]} : vector<1x25x145xf32> to vector<1x16x16xf32>
      %234 = vector.extract_strided_slice %229 {offsets = [0, 8, 129], sizes = [1, 16, 16], strides = [1, 1, 1]} : vector<1x25x145xf32> to vector<1x16x16xf32>
      %235 = vector.extract_strided_slice %229 {offsets = [0, 9, 127], sizes = [1, 16, 16], strides = [1, 1, 1]} : vector<1x25x145xf32> to vector<1x16x16xf32>
      %236 = vector.extract_strided_slice %229 {offsets = [0, 9, 128], sizes = [1, 16, 16], strides = [1, 1, 1]} : vector<1x25x145xf32> to vector<1x16x16xf32>
      %237 = vector.extract_strided_slice %229 {offsets = [0, 9, 129], sizes = [1, 16, 16], strides = [1, 1, 1]} : vector<1x25x145xf32> to vector<1x16x16xf32>
      %238 = arith.subf %232, %230 : vector<1x16x16xf32>
      %239 = arith.subf %234, %233 : vector<1x16x16xf32>
      %cst_106 = arith.constant 2.000000e+00 : f32
      %240 = vector.broadcast %cst_106 : f32 to vector<1x16x16xf32>
      %241 = arith.mulf %240, %239 : vector<1x16x16xf32>
      %242 = arith.addf %238, %241 : vector<1x16x16xf32>
      %243 = arith.subf %237, %235 : vector<1x16x16xf32>
      %244 = arith.addf %242, %243 : vector<1x16x16xf32>
      %245 = arith.subf %230, %235 : vector<1x16x16xf32>
      %246 = arith.subf %231, %236 : vector<1x16x16xf32>
      %cst_107 = arith.constant 2.000000e+00 : f32
      %247 = vector.broadcast %cst_107 : f32 to vector<1x16x16xf32>
      %248 = arith.mulf %247, %246 : vector<1x16x16xf32>
      %249 = arith.addf %245, %248 : vector<1x16x16xf32>
      %250 = arith.subf %232, %237 : vector<1x16x16xf32>
      %251 = arith.addf %249, %250 : vector<1x16x16xf32>
      %252 = math.absf %244 : vector<1x16x16xf32>
      %253 = math.absf %251 : vector<1x16x16xf32>
      %254 = arith.addf %252, %253 : vector<1x16x16xf32>
      %c3_108 = arith.constant 3 : index
      %c0_109 = arith.constant 0 : index
      %c0_110 = arith.constant 0 : index
      %c0_111 = arith.constant 0 : index
      %255 = vector.load %arg7[%c3_108, %c0_109, %c0_110, %c0_111] : memref<5x1x16x16xf32, #tpu.memory_space<vmem>>, vector<1x1x16x16xf32>
      %256 = vector.shape_cast %255 : vector<1x1x16x16xf32> to vector<1x16x16xf32>
      %257 = vector.shape_cast %227 : vector<1x16x16xf32> to vector<1x1x16x16xf32>
      tpu.vector_store %arg7[%c3_108, %c0_109, %c0_110, %c0_111], %257 {strides = array<i32>} : memref<5x1x16x16xf32, #tpu.memory_space<vmem>>, vector<1x1x16x16xf32>,
      %258 = arith.maximumf %227, %254 : vector<1x16x16xf32>
      %c4_112 = arith.constant 4 : index
      %c0_113 = arith.constant 0 : index
      %c0_114 = arith.constant 0 : index
      %c0_115 = arith.constant 0 : index
      %259 = vector.load %arg7[%c4_112, %c0_113, %c0_114, %c0_115] : memref<5x1x16x16xf32, #tpu.memory_space<vmem>>, vector<1x1x16x16xf32>
      %260 = vector.shape_cast %259 : vector<1x1x16x16xf32> to vector<1x16x16xf32>
      %261 = vector.shape_cast %258 : vector<1x16x16xf32> to vector<1x1x16x16xf32>
      tpu.vector_store %arg7[%c4_112, %c0_113, %c0_114, %c0_115], %261 {strides = array<i32>} : memref<5x1x16x16xf32, #tpu.memory_space<vmem>>, vector<1x1x16x16xf32>,
    } else {
    }
    %c0 = arith.constant 0 : index
    %c0_1 = arith.constant 0 : index
    %c0_2 = arith.constant 0 : index
    %c0_3 = arith.constant 0 : index
    %c0_4 = arith.constant 0 : index
    %3 = vector.load %arg2[%c0, %c0_1, %c0_2, %c0_3, %c0_4] : memref<1x1x3x16x16xf32, #tpu.memory_space<vmem>>, vector<1x1x3x16x16xf32>
    %4 = vector.shape_cast %3 : vector<1x1x3x16x16xf32> to vector<1x3x16x16xf32>
    %5 = vector.extract_strided_slice %4 {offsets = [0, 0, 0, 0], sizes = [1, 1, 16, 16], strides = [1, 1, 1, 1]} : vector<1x3x16x16xf32> to vector<1x1x16x16xf32>
    %6 = vector.shape_cast %5 : vector<1x1x16x16xf32> to vector<1x16x16xf32>
    %7 = vector.extract_strided_slice %4 {offsets = [0, 1, 0, 0], sizes = [1, 1, 16, 16], strides = [1, 1, 1, 1]} : vector<1x3x16x16xf32> to vector<1x1x16x16xf32>
    %8 = vector.shape_cast %7 : vector<1x1x16x16xf32> to vector<1x16x16xf32>
    %9 = vector.extract_strided_slice %4 {offsets = [0, 2, 0, 0], sizes = [1, 1, 16, 16], strides = [1, 1, 1, 1]} : vector<1x3x16x16xf32> to vector<1x1x16x16xf32>
    %10 = vector.shape_cast %9 : vector<1x1x16x16xf32> to vector<1x16x16xf32>
    %cst = arith.constant 2.990000e-01 : f32
    %11 = vector.broadcast %cst : f32 to vector<1x16x16xf32>
    %12 = arith.mulf %11, %6 : vector<1x16x16xf32>
    %cst_5 = arith.constant 5.870000e-01 : f32
    %13 = vector.broadcast %cst_5 : f32 to vector<1x16x16xf32>
    %14 = arith.mulf %13, %8 : vector<1x16x16xf32>
    %15 = arith.addf %12, %14 : vector<1x16x16xf32>
    %cst_6 = arith.constant 1.140000e-01 : f32
    %16 = vector.broadcast %cst_6 : f32 to vector<1x16x16xf32>
    %17 = arith.mulf %16, %10 : vector<1x16x16xf32>
    %18 = arith.addf %15, %17 : vector<1x16x16xf32>
    %19 = arith.subf %6, %18 : vector<1x16x16xf32>
    %cst_7 = arith.constant 0.712999999 : f32
    %20 = vector.broadcast %cst_7 : f32 to vector<1x16x16xf32>
    %21 = arith.mulf %19, %20 : vector<1x16x16xf32>
    %cst_8 = arith.constant 5.000000e-01 : f32
    %22 = vector.broadcast %cst_8 : f32 to vector<1x16x16xf32>
    %23 = arith.addf %21, %22 : vector<1x16x16xf32>
    %cst_9 = arith.constant 0.000000e+00 : f32
    %cst_10 = arith.constant 1.000000e+00 : f32
    %24 = vector.broadcast %cst_9 : f32 to vector<1x16x16xf32>
    %25 = arith.maximumf %24, %23 : vector<1x16x16xf32>
    %26 = vector.broadcast %cst_10 : f32 to vector<1x16x16xf32>
    %27 = arith.minimumf %26, %25 : vector<1x16x16xf32>
    %28 = arith.subf %10, %18 : vector<1x16x16xf32>
    %cst_11 = arith.constant 5.640000e-01 : f32
    %29 = vector.broadcast %cst_11 : f32 to vector<1x16x16xf32>
    %30 = arith.mulf %28, %29 : vector<1x16x16xf32>
    %cst_12 = arith.constant 5.000000e-01 : f32
    %31 = vector.broadcast %cst_12 : f32 to vector<1x16x16xf32>
    %32 = arith.addf %30, %31 : vector<1x16x16xf32>
    %cst_13 = arith.constant 0.000000e+00 : f32
    %cst_14 = arith.constant 1.000000e+00 : f32
    %33 = vector.broadcast %cst_13 : f32 to vector<1x16x16xf32>
    %34 = arith.maximumf %33, %32 : vector<1x16x16xf32>
    %35 = vector.broadcast %cst_14 : f32 to vector<1x16x16xf32>
    %36 = arith.minimumf %35, %34 : vector<1x16x16xf32>
    %cst_15 = arith.constant 0.000000e+00 : f32
    %cst_16 = arith.constant 1.000000e+00 : f32
    %37 = vector.broadcast %cst_15 : f32 to vector<1x16x16xf32>
    %38 = arith.maximumf %37, %18 : vector<1x16x16xf32>
    %39 = vector.broadcast %cst_16 : f32 to vector<1x16x16xf32>
    %40 = arith.minimumf %39, %38 : vector<1x16x16xf32>
    %c0_17 = arith.constant 0 : index
    %c0_18 = arith.constant 0 : index
    %c0_19 = arith.constant 0 : index
    %c0_20 = arith.constant 0 : index
    %41 = vector.load %arg7[%c0_17, %c0_18, %c0_19, %c0_20] : memref<5x1x16x16xf32, #tpu.memory_space<vmem>>, vector<1x1x16x16xf32>
    %42 = vector.shape_cast %41 : vector<1x1x16x16xf32> to vector<1x16x16xf32>
    %43 = arith.subf %40, %42 : vector<1x16x16xf32>
    %44 = math.absf %43 : vector<1x16x16xf32>
    %45 = vector.shape_cast %44 : vector<1x16x16xf32> to vector<1x1x16x16xf32>
    %cst_21 = arith.constant dense<0.000000e+00> : vector<1xf32>
    %46 = vector.multi_reduction <add>, %45, %cst_21 [1, 2, 3] : vector<1x1x16x16xf32> to vector<1xf32>
    %47 = vector.shape_cast %46 : vector<1xf32> to vector<1x1x1x1xf32>
    %48 = vector.extract %47[0, 0, 0, 0] : f32 from vector<1x1x1x1xf32>
    %c1 = arith.constant 1 : index
    %c0_22 = arith.constant 0 : index
    %c0_23 = arith.constant 0 : index
    %c0_24 = arith.constant 0 : index
    %49 = vector.load %arg7[%c1, %c0_22, %c0_23, %c0_24] : memref<5x1x16x16xf32, #tpu.memory_space<vmem>>, vector<1x1x16x16xf32>
    %50 = vector.shape_cast %49 : vector<1x1x16x16xf32> to vector<1x16x16xf32>
    %51 = arith.subf %36, %50 : vector<1x16x16xf32>
    %52 = math.absf %51 : vector<1x16x16xf32>
    %53 = vector.shape_cast %52 : vector<1x16x16xf32> to vector<1x1x16x16xf32>
    %cst_25 = arith.constant dense<0.000000e+00> : vector<1xf32>
    %54 = vector.multi_reduction <add>, %53, %cst_25 [1, 2, 3] : vector<1x1x16x16xf32> to vector<1xf32>
    %55 = vector.shape_cast %54 : vector<1xf32> to vector<1x1x1x1xf32>
    %56 = vector.extract %55[0, 0, 0, 0] : f32 from vector<1x1x1x1xf32>
    %c2 = arith.constant 2 : index
    %c0_26 = arith.constant 0 : index
    %c0_27 = arith.constant 0 : index
    %c0_28 = arith.constant 0 : index
    %57 = vector.load %arg7[%c2, %c0_26, %c0_27, %c0_28] : memref<5x1x16x16xf32, #tpu.memory_space<vmem>>, vector<1x1x16x16xf32>
    %58 = vector.shape_cast %57 : vector<1x1x16x16xf32> to vector<1x16x16xf32>
    %59 = arith.subf %27, %58 : vector<1x16x16xf32>
    %60 = math.absf %59 : vector<1x16x16xf32>
    %61 = vector.shape_cast %60 : vector<1x16x16xf32> to vector<1x1x16x16xf32>
    %cst_29 = arith.constant dense<0.000000e+00> : vector<1xf32>
    %62 = vector.multi_reduction <add>, %61, %cst_29 [1, 2, 3] : vector<1x1x16x16xf32> to vector<1xf32>
    %63 = vector.shape_cast %62 : vector<1xf32> to vector<1x1x1x1xf32>
    %64 = vector.extract %63[0, 0, 0, 0] : f32 from vector<1x1x1x1xf32>
    %c0_30 = arith.constant 0 : index
    %c8 = arith.constant 8 : index
    %c128 = arith.constant 128 : index
    %65 = vector.load %arg6[%c0_30, %c8, %c128] : memref<1x25x145xf32, #tpu.memory_space<vmem>>, vector<1x16x16xf32>
    tpu.vector_store %arg6[%c0_30, %c8, %c128], %40 {strides = array<i32>} : memref<1x25x145xf32, #tpu.memory_space<vmem>>, vector<1x16x16xf32>,
    %c0_31 = arith.constant 0 : index
    %c0_32 = arith.constant 0 : index
    %c0_33 = arith.constant 0 : index
    %66 = vector.load %arg6[%c0_31, %c0_32, %c0_33] : memref<1x25x145xf32, #tpu.memory_space<vmem>>, vector<1x25x145xf32>
    %67 = vector.extract_strided_slice %66 {offsets = [0, 7, 127], sizes = [1, 16, 16], strides = [1, 1, 1]} : vector<1x25x145xf32> to vector<1x16x16xf32>
    %68 = vector.extract_strided_slice %66 {offsets = [0, 7, 128], sizes = [1, 16, 16], strides = [1, 1, 1]} : vector<1x25x145xf32> to vector<1x16x16xf32>
    %69 = vector.extract_strided_slice %66 {offsets = [0, 7, 129], sizes = [1, 16, 16], strides = [1, 1, 1]} : vector<1x25x145xf32> to vector<1x16x16xf32>
    %70 = vector.extract_strided_slice %66 {offsets = [0, 8, 127], sizes = [1, 16, 16], strides = [1, 1, 1]} : vector<1x25x145xf32> to vector<1x16x16xf32>
    %71 = vector.extract_strided_slice %66 {offsets = [0, 8, 129], sizes = [1, 16, 16], strides = [1, 1, 1]} : vector<1x25x145xf32> to vector<1x16x16xf32>
    %72 = vector.extract_strided_slice %66 {offsets = [0, 9, 127], sizes = [1, 16, 16], strides = [1, 1, 1]} : vector<1x25x145xf32> to vector<1x16x16xf32>
    %73 = vector.extract_strided_slice %66 {offsets = [0, 9, 128], sizes = [1, 16, 16], strides = [1, 1, 1]} : vector<1x25x145xf32> to vector<1x16x16xf32>
    %74 = vector.extract_strided_slice %66 {offsets = [0, 9, 129], sizes = [1, 16, 16], strides = [1, 1, 1]} : vector<1x25x145xf32> to vector<1x16x16xf32>
    %75 = arith.subf %69, %67 : vector<1x16x16xf32>
    %76 = arith.subf %71, %70 : vector<1x16x16xf32>
    %cst_34 = arith.constant 2.000000e+00 : f32
    %77 = vector.broadcast %cst_34 : f32 to vector<1x16x16xf32>
    %78 = arith.mulf %77, %76 : vector<1x16x16xf32>
    %79 = arith.addf %75, %78 : vector<1x16x16xf32>
    %80 = arith.subf %74, %72 : vector<1x16x16xf32>
    %81 = arith.addf %79, %80 : vector<1x16x16xf32>
    %82 = arith.subf %67, %72 : vector<1x16x16xf32>
    %83 = arith.subf %68, %73 : vector<1x16x16xf32>
    %cst_35 = arith.constant 2.000000e+00 : f32
    %84 = vector.broadcast %cst_35 : f32 to vector<1x16x16xf32>
    %85 = arith.mulf %84, %83 : vector<1x16x16xf32>
    %86 = arith.addf %82, %85 : vector<1x16x16xf32>
    %87 = arith.subf %69, %74 : vector<1x16x16xf32>
    %88 = arith.addf %86, %87 : vector<1x16x16xf32>
    %89 = math.absf %81 : vector<1x16x16xf32>
    %90 = math.absf %88 : vector<1x16x16xf32>
    %91 = arith.addf %89, %90 : vector<1x16x16xf32>
    %c4 = arith.constant 4 : index
    %c0_36 = arith.constant 0 : index
    %c0_37 = arith.constant 0 : index
    %c0_38 = arith.constant 0 : index
    %92 = vector.load %arg7[%c4, %c0_36, %c0_37, %c0_38] : memref<5x1x16x16xf32, #tpu.memory_space<vmem>>, vector<1x1x16x16xf32>
    %93 = vector.shape_cast %92 : vector<1x1x16x16xf32> to vector<1x16x16xf32>
    %94 = arith.subf %91, %93 : vector<1x16x16xf32>
    %95 = math.absf %94 : vector<1x16x16xf32>
    %96 = vector.shape_cast %95 : vector<1x16x16xf32> to vector<1x1x16x16xf32>
    %cst_39 = arith.constant dense<0.000000e+00> : vector<1xf32>
    %97 = vector.multi_reduction <add>, %96, %cst_39 [1, 2, 3] : vector<1x1x16x16xf32> to vector<1xf32>
    %98 = vector.shape_cast %97 : vector<1xf32> to vector<1x1x1x1xf32>
    %99 = vector.extract %98[0, 0, 0, 0] : f32 from vector<1x1x1x1xf32>
    %c3 = arith.constant 3 : index
    %c0_40 = arith.constant 0 : index
    %c0_41 = arith.constant 0 : index
    %c0_42 = arith.constant 0 : index
    %100 = vector.load %arg7[%c3, %c0_40, %c0_41, %c0_42] : memref<5x1x16x16xf32, #tpu.memory_space<vmem>>, vector<1x1x16x16xf32>
    %101 = vector.shape_cast %100 : vector<1x1x16x16xf32> to vector<1x16x16xf32>
    %102 = arith.subf %91, %101 : vector<1x16x16xf32>
    %103 = math.absf %102 : vector<1x16x16xf32>
    %104 = vector.shape_cast %103 : vector<1x16x16xf32> to vector<1x1x16x16xf32>
    %cst_43 = arith.constant dense<0.000000e+00> : vector<1xf32>
    %105 = vector.multi_reduction <add>, %104, %cst_43 [1, 2, 3] : vector<1x1x16x16xf32> to vector<1xf32>
    %106 = vector.shape_cast %105 : vector<1xf32> to vector<1x1x1x1xf32>
    %107 = vector.extract %106[0, 0, 0, 0] : f32 from vector<1x1x1x1xf32>
    %108 = tpu.iota {dimensions = array<i32: 0>} : vector<8x128xi32>
    %c0_i32_44 = arith.constant 0 : i32
    %109 = vector.broadcast %c0_i32_44 : i32 to vector<8x128xi32>
    %110 = arith.cmpi eq, %108, %109 : vector<8x128xi32>
    %cst_45 = arith.constant 0.000000e+00 : f32
    %111 = vector.broadcast %48 : f32 to vector<8x128xf32>
    %112 = vector.broadcast %cst_45 : f32 to vector<8x128xf32>
    %113 = arith.select %110, %111, %112 : vector<8x128xi1>, vector<8x128xf32>
    %c1_i32 = arith.constant 1 : i32
    %114 = vector.broadcast %c1_i32 : i32 to vector<8x128xi32>
    %115 = arith.cmpi eq, %108, %114 : vector<8x128xi32>
    %116 = vector.broadcast %56 : f32 to vector<8x128xf32>
    %117 = arith.select %115, %116, %113 : vector<8x128xi1>, vector<8x128xf32>
    %c2_i32 = arith.constant 2 : i32
    %118 = vector.broadcast %c2_i32 : i32 to vector<8x128xi32>
    %119 = arith.cmpi eq, %108, %118 : vector<8x128xi32>
    %120 = vector.broadcast %64 : f32 to vector<8x128xf32>
    %121 = arith.select %119, %120, %117 : vector<8x128xi1>, vector<8x128xf32>
    %c3_i32 = arith.constant 3 : i32
    %122 = vector.broadcast %c3_i32 : i32 to vector<8x128xi32>
    %123 = arith.cmpi eq, %108, %122 : vector<8x128xi32>
    %124 = vector.broadcast %99 : f32 to vector<8x128xf32>
    %125 = arith.select %123, %124, %121 : vector<8x128xi1>, vector<8x128xf32>
    %c4_i32 = arith.constant 4 : i32
    %126 = vector.broadcast %c4_i32 : i32 to vector<8x128xi32>
    %127 = arith.cmpi eq, %108, %126 : vector<8x128xi32>
    %128 = vector.broadcast %107 : f32 to vector<8x128xf32>
    %129 = arith.select %127, %128, %125 : vector<8x128xi1>, vector<8x128xf32>
    %c0_46 = arith.constant 0 : index
    %c0_47 = arith.constant 0 : index
    %c0_48 = arith.constant 0 : index
    %c0_49 = arith.constant 0 : index
    %130 = vector.load %arg5[%c0_46, %c0_47, %c0_48, %c0_49] : memref<1x1x8x128xf32, #tpu.memory_space<vmem>>, vector<1x1x8x128xf32>
    %131 = vector.shape_cast %130 : vector<1x1x8x128xf32> to vector<8x128xf32>
    %132 = vector.shape_cast %129 : vector<8x128xf32> to vector<1x1x8x128xf32>
    tpu.vector_store %arg5[%c0_46, %c0_47, %c0_48, %c0_49], %132 {strides = array<i32>} : memref<1x1x8x128xf32, #tpu.memory_space<vmem>>, vector<1x1x8x128xf32>,
    return
  }
  func.func @transform_0(%arg0: i32, %arg1: i32) -> (i32, i32, i32, i32, i32) {
    %c0_i32 = arith.constant 0 : i32
    %c0_i32_0 = arith.constant 0 : i32
    %c0_i32_1 = arith.constant 0 : i32
    %c0_i32_2 = arith.constant 0 : i32
    return %arg1, %arg0, %c0_i32, %c0_i32_0, %c0_i32_1 : i32, i32, i32, i32, i32
  }
  func.func @transform_1(%arg0: i32, %arg1: i32) -> (i32, i32, i32, i32) {
    %c0_i32 = arith.constant 0 : i32
    %c0_i32_0 = arith.constant 0 : i32
    %c0_i32_1 = arith.constant 0 : i32
    %c0_i32_2 = arith.constant 0 : i32
    return %arg0, %c0_i32, %c0_i32_0, %c0_i32_1 : i32, i32, i32, i32
  }
  func.func @transform_2(%arg0: i32, %arg1: i32) -> (i32, i32, i32, i32) {
    %c0_i32 = arith.constant 0 : i32
    %c0_i32_0 = arith.constant 0 : i32
    %c0_i32_1 = arith.constant 0 : i32
    %c0_i32_2 = arith.constant 0 : i32
    return %arg0, %c0_i32, %c0_i32_0, %c0_i32_1 : i32, i32, i32, i32
  }
  func.func @transform_3(%arg0: i32, %arg1: i32) -> (i32, i32, i32, i32) {
    %c0_i32 = arith.constant 0 : i32
    %c0_i32_0 = arith.constant 0 : i32
    %c0_i32_1 = arith.constant 0 : i32
    return %arg0, %arg1, %c0_i32, %c0_i32_0 : i32, i32, i32, i32
  }
}

</mosaic_0001>

<bundles_post_ra>
// kernel: tpu_custom_call.1
= control target key start
LH: loop header
LB: loop body
LE: loop exit
PB: predicated region body
PF: predicated region fallthrough
CT: control target
= control target key end

     0   :  { %s2398_s0 = inlined_call_operand.hbm [shape: f32[2,2,3,16,16], index: 0, kind: input, shape index: {}]   ;;  %s2399_s1 = inlined_call_operand.hbm [shape: f32[2,3,16,16], index: 1, kind: input, shape index: {}]   ;;  %s2400_s2 = inlined_call_operand.hbm [shape: f32[2,3,16,16], index: 2, kind: input, shape index: {}]   ;;  %s2401_s3 = inlined_call_operand.hbm [shape: f32[2,2,8,128], index: 3, kind: output, shape index: {}]  }
   0x1   :  { %2422 = sst [smem:[#allocation24_spill]] %s2399_s1 }
   0x2   :  { %2423 = sst [smem:[#allocation25_spill]] %s2401_s3 }
   0x3   :  { %8 = vsyncpa [#allocation5], 0 }
   0x4   :  { %10 = vsyncpa [#allocation5 + $0x1], 0 }
   0x5   :  { %11 = vsyncpa [#allocation8], 0 }
   0x6   :  { %13 = vsyncpa [#allocation8 + $0x1], 0 }
   0x7   :  { %14 = vsyncpa [#allocation6], 0 }
   0x8   :  { %16 = vsyncpa [#allocation6 + $0x1], 0  ;;  %s1709_s12 = smov 0   ;;  %s1711_s13 = smov 0  }
   0x9   :  { %s1713_s14 = smov 0   ;;  %s1715_s15 = smov 0  }
   0xa   :  { %s1717_s16 = smov 0   ;;  %s1719_s17 = smov 0  }
   0xb   :  { %s1721_s18 = smov 0   ;;  %s1723_s19 = smov 0  }
   0xc   :  { %s1725_s20 = smov 0   ;;  %s1727_s21 = smov 0  }
   0xd   :  { %s1729_s22 = smov 0  }
   0xe LB: > { %2424 = sst [smem:[#allocation14_spill]] %s1641_s14  ;;  %s34_s23 = sadd.s32 1, %s1669_s21  ;;  %s1673_s22 = sphi %s1729_s22, %s22_s22   ;;  %s1669_s21 = sphi %s1727_s21, %s2475_s21   ;;  %s1665_s20 = sphi %s1725_s20, %s2468_s20   ;;  %s1661_s19 = sphi %s1723_s19, %s2474_s19   ;;  %s1657_s18 = sphi %s1721_s18, %s2467_s18   ;;  %s1653_s17 = sphi %s1719_s17, %s2466_s17   ;;  %s1649_s16 = sphi %s1717_s16, %s2473_s16   ;;  %s1645_s15 = sphi %s1715_s15, %s2472_s15   ;;  %s1641_s14 = sphi %s1713_s14, %s2464_s14   ;;  %s1637_s13 = sphi %s1711_s13, %s2471_s13   ;;  %s1633_s12 = sphi %s1709_s12, %s2470_s12  }
   0xf   : > { %2425 = sst [smem:[#allocation15_spill]] %s1653_s17  ;;  %p2403_p0 = scmp.eq.s32.totalorder %s1673_s22, 0 }
  0x10   : > { %2426 = sst [smem:[#allocation16_spill]] %s1657_s18  ;;  %p76_p1 = scmp.ne.s32.totalorder %s1641_s14, %s1637_s13 }
  0x11   : > { %2427 = sst [smem:[#allocation17_spill]] %s1661_s19  ;;  %p2402_p4 = scmp.lt.s32.totalorder %s1673_s22, 4 }
  0x12   : > { %2428 = sst [smem:[#allocation18_spill]] %s1665_s20  ;;  %p78_p3 = por %p76_p1, %p2403_p0 }
  0x13   : > { %s183_s25 = sand.u32 1, %s1673_s22   ;;  %s185_s26 = sand.u32 1, %s1641_s14  }
  0x14   : > { %s1776_s27 = smul.u32 48, %s185_s26  ;;  %p1781_p5 = pnand %p2402_p4, %p78_p3 }
  0x15   : > { %s2408_s28 = smul.u32 768, %s1669_s21  ;;  %p1288_p6 = scmp.ge.s32.totalorder %s1673_s22, 1 }
  0x16   : > { %s2430_s1 = sld [smem:[#allocation24_spill]]  ;;  %s187_s6 = scalar_lea.vmem [#allocation7], %s1776_s27 }
  0x17   : > { %s194_s7 = sshll.u32 %s187_s6, 4  ;;  %s1796_s8 = scalar_lea.sflag [#allocation8], %s183_s25  ;;  %s1794_s7 = int_to_ptr.vmem [resolvable:$true] %s194_s7 }
  0x18   : > { %p2409_p8 = pneg %p1781_p5 }
  0x1c   : > { %s1791_s5 = scalar_lea.hbm %s2430_s1, %s2408_s28  ;;  %s1462_s26 = scalar_lea.hbm %s2430_s1, 1536 }
  0x1d   : > { %s1457_s9 = scalar_lea.hbm %s1791_s5, 768  ;;  %p1463_p11 = scmp.lt.u32.totalorder %s1791_s5, %s2430_s1 }
  0x1e   : > { %p1458_p7 = scmp.ne.s32.totalorder %s1791_s5, %s1457_s9  ;;  %p1464_p12 = scmp.lt.u32.totalorder %s1462_s26, %s1457_s9 }
  0x1f   : > { %p1466_p1 = scmp.lt.u32.totalorder %s1457_s9, %s1791_s5 }
  0x20   : > { %p1460_p9 = pnand %p2409_p8, %p1458_p7  ;;  %p1465_p13 = por %p1464_p12, %p1463_p11 }
  0x22   : > { %p1461_p10 = pneg %p1460_p9  ;;  %p1467_p3 = por %p1466_p1, %p1465_p13 }
  0x24   : > { %p1468_p4 = pnand %p1467_p3, %p1461_p10 }
  0x26   : > { %1471 = shalt.err (!%p1468_p4)
}
  0x27   : > { %s1472_s25 = scalar_lea.vmem %s1794_s7, 768  ;;  %s1675_s6 = smov [#allocation7]  }
  0x28   : > { %p1473_p7 = scmp.ne.s32.totalorder %s1794_s7, %s1472_s25  ;;  %s1477_s10 = sshll.u32 %s1675_s6, 4  ;;  %s1478_s10 = int_to_ptr.vmem [resolvable:$false] %s1477_s10 }
  0x29   : > { %s1479_s11 = scalar_lea.vmem %s1478_s10, 1536  ;;  %p1480_p0 = scmp.lt.s32.totalorder %s1794_s7, %s1478_s10 }
  0x2a   : > { %p1475_p9 = pnand %p1473_p7, %p2409_p8  ;;  %p1481_p11 = scmp.lt.s32.totalorder %s1479_s11, %s1472_s25 }
  0x2c   : > { %p1476_p2 = pneg %p1475_p9  ;;  %p1482_p12 = por %p1481_p11, %p1480_p0 }
  0x2e   : > { %p1483_p13 = pnand %p1482_p12, %p1476_p2 }
  0x30   : > { %1486 = shalt.err (!%p1483_p13)
}
  0x31   : > { %s2404_s9 = smov 128   ;;  %s2406_s26 = smov 8  }
  0x32   : > { %1329 = dma.hbm_to_vmem [thread:$0]  (!%p1781_p5), %s1791_s5, 768, %s1794_s7, %s1796_s8, %s2404_s9, %s2404_s9, %s2406_s26  }
  0x33   : > { %p223_p0 = scmp.lt.s32.totalorder %s1673_s22, 5  ;;  %s1835_s4 = sadd.s32 4294967295, %s1673_s22  }
  0x34   : > { %s1282_s25 = sadd.s32 4294967294, %s1673_s22   ;;  %s31_s6 = sadd.s32 1, %s1665_s20 }
  0x35   : > { %p1830_p2 = pnand %p1288_p6, %p223_p0  ;;  %s43_s10 = sadd.s32 1, %s1653_s17 }
  0x36   : > { %p32_p4 = scmp.ge.s32.totalorder %s31_s6, 2  ;;  %p50_p10 = scmp.ne.s32.totalorder %s1653_s17, %s1649_s16 }
  0x37   : > { %s2431_s30 = scalar_select %p1830_p2, 1, 0 }
  0x38   : > { %p2410_p1 = scmp.ne.s32.totalorder %s1649_s16, %s1645_s15  ;;  %p57_p3 = scmp.eq.s32.totalorder %s1835_s4, 0 }
  0x39   : > { %s2477_s6 = smov (%p32_p4, %s31_s6), 0  ;;  %s2479_s23 = smov (!%p32_p4, %s34_s23), %s1669_s21 }
  0x3a   : > { %2432 = sst [smem:[#allocation19_spill]] %s2477_s6  ;;  %s38_s5 = ssub.s32 %s1665_s20, %s2477_s6 }
  0x3b   : > { %p2433_p6 = scmp.eq.s32.totalorder %s1673_s22, 0  ;;  %p36_p9 = scmp.ge.s32.totalorder %s2479_s23, 2 }
  0x3c   : > { %p1861_p11 = por %p57_p3, %p2410_p1  ;;  %p2436_p12 = scmp.ne.s32.totalorder %s1637_s13, %s1633_s12 }
  0x3d   : > { %p1854_p7 = por %p2433_p6, %p50_p10  ;;  %p134_p0 = scmp.eq.s32.totalorder %s1835_s4, 3 }
  0x3e   : > { %s2435_s11 = scalar_select %p1861_p11, 1, 0 }
  0x3f   : > { %p1868_p13 = por %p2436_p12, %p57_p3  ;;  %s2481_s23 = smov (%p36_p9, %s2479_s23), 0 }
  0x40   : > { %2439 = sst [smem:[#allocation21_spill]] %s2481_s23  ;;  %p1875_p4 = por %p134_p0, %p50_p10 }
  0x41   : > { %s2437_s9 = scalar_select %p1868_p13, 1, 0 }
  0x42   : > { %s2440_s26 = scalar_select %p1875_p4, 1, 0 }
  0x43   : > { %2438 = sst [smem:[#allocation20_spill]] %s2437_s9  ;;  %p140_p6 = scmp.eq.s32.totalorder %s1282_s25, 3 }
  0x44   : > { %s39_s28 = ssub.s32 %s1669_s21, %s2481_s23  ;;  %s160_s24 = sand.u32 1, %s1653_s17  }
  0x45   : > { %s40_s1 = sor.u32 %s39_s28, %s38_s5  ;;  %p67_p8 = scmp.eq.s32.totalorder %s39_s28, 0 }
  0x46   : > { %p41_p1 = scmp.eq.s32.totalorder %s40_s1, 0  ;;  %p2441_p3 = scmp.ne.s32.totalorder %s1649_s16, %s1645_s15 }
  0x47   : > { %s2443_s6 = sadd.s32 1, %s1641_s14  ;;  %s1296_s18 = smul.u32 48, %s160_s24 }
  0x48   : > { %p1885_p12 = por %p140_p6, %p2441_p3  ;;  %s1297_s9 = smul.u32 6, %s1669_s21 }
  0x49   : > { %s1892_s3 = scalar_select %p67_p8, %s1641_s14, %s2443_s6  }
  0x4a   : > { %s2442_s12 = scalar_select %p1885_p12, 1, 0 }
  0x4b   : > { %2444 = sst [smem:[#allocation22_spill]] %s1892_s3  ;;  %p2446_p10 = scmp.lt.s32.totalorder %s1673_s22, 4 }
  0x4c   : > { %s1895_s19 = scalar_select %p41_p1, %s1653_s17, %s43_s10  }
  0x4d   : > { %p1902_p9 = pnand %p2446_p10, %p1854_p7  ;;  %s1298_s1 = smul.u32 12, %s1665_s20 }
  0x4e   : > { %2445 = sst [smem:[#allocation23_spill]] %s1895_s19  ;;  %s164_s28 = scalar_lea.vmem [#allocation4], %s1296_s18 }
  0x4f   : > { %s173_s5 = sshll.u32 %s164_s28, 4  ;;  %s170_s23 = sadd.s32 %s1298_s1, %s1297_s9  ;;  %s1907_s5 = int_to_ptr.vmem [resolvable:$true] %s173_s5 }
  0x50   : > { %s1285_s6 = sshll.u32 %s170_s23, 7  ;;  %s2448_s7 = smul.u32 768, %s1669_s21 }
  0x51   : > { %s1912_s19 = scalar_lea.hbm %s2398_s0, %s1285_s6  ;;  %s1921_s18 = scalar_lea.sflag [#allocation5], %s160_s24 }
  0x52   : > { %s1919_s20 = scalar_lea.hbm %s2400_s2, %s2448_s7  ;;  %s1487_s9 = scalar_lea.hbm %s1912_s19, 768 }
  0x53   : > { %p1488_p8 = scmp.ne.s32.totalorder %s1912_s19, %s1487_s9  ;;  %p1489_p1 = pneg %p1902_p9 }
  0x54   : > { %s1492_s14 = scalar_lea.hbm %s2398_s0, 3072  ;;  %p1493_p6 = scmp.lt.u32.totalorder %s1912_s19, %s2398_s0 }
  0x55   : > { %p1490_p7 = pnand %p1489_p1, %p1488_p8  ;;  %p1494_p3 = scmp.lt.u32.totalorder %s1492_s14, %s1487_s9 }
  0x56   : > { %p1496_p12 = scmp.lt.u32.totalorder %s1487_s9, %s1912_s19 }
  0x57   : > { %p1491_p0 = pneg %p1490_p7  ;;  %p1495_p10 = por %p1494_p3, %p1493_p6 }
  0x59   : > { %p1497_p4 = por %p1496_p12, %p1495_p10 }
  0x5b   : > { %p1498_p13 = pnand %p1497_p4, %p1491_p0 }
  0x5d   : > { %1501 = shalt.err (!%p1498_p13)
}
  0x5e   : > { %s1502_s24 = scalar_lea.vmem %s1907_s5, 768  ;;  %s1678_s28 = smov [#allocation4]  }
  0x5f   : > { %p1503_p8 = scmp.ne.s32.totalorder %s1907_s5, %s1502_s24  ;;  %s1507_s6 = sshll.u32 %s1678_s28, 4  ;;  %s1508_s6 = int_to_ptr.vmem [resolvable:$false] %s1507_s6 }
  0x60   : > { %s1509_s10 = scalar_lea.vmem %s1508_s6, 1536  ;;  %p1510_p2 = scmp.lt.s32.totalorder %s1907_s5, %s1508_s6 }
  0x61   : > { %p1505_p7 = pnand %p1503_p8, %p1489_p1  ;;  %p1511_p6 = scmp.lt.s32.totalorder %s1509_s10, %s1502_s24 }
  0x63   : > { %p1506_p11 = pneg %p1505_p7  ;;  %p1512_p3 = por %p1511_p6, %p1510_p2 }
  0x65   : > { %p1513_p12 = pnand %p1512_p3, %p1506_p11 }
  0x67   : > { %1516 = shalt.err (!%p1513_p12)
}
  0x68   : > { %s2449_s7 = smov 8   ;;  %s2450_s9 = smov 128  }
  0x69   : > { %1326 = dma.hbm_to_vmem [thread:$0]  (!%p1902_p9), %s1912_s19, 768, %s1907_s5, %s1921_s18, %s2450_s9, %s2450_s9, %s2449_s7  }
  0x6a   : > { %s208_s3 = scalar_lea.vmem [#allocation9], %s1776_s27  ;;  %s1517_s14 = scalar_lea.hbm %s1919_s20, 768 }
  0x6b   : > { %s215_s23 = sshll.u32 %s208_s3, 4  ;;  %p1518_p2 = scmp.ne.s32.totalorder %s1919_s20, %s1517_s14  ;;  %s1953_s23 = int_to_ptr.vmem [resolvable:$true] %s215_s23 }
  0x6c   : > { %p2451_p11 = pneg %p1781_p5  ;;  %s1522_s1 = scalar_lea.hbm %s2400_s2, 1536 }
  0x6d   : > { %p1523_p1 = scmp.lt.u32.totalorder %s1919_s20, %s2400_s2  ;;  %p1524_p0 = scmp.lt.u32.totalorder %s1522_s1, %s1517_s14 }
  0x6e   : > { %p1520_p13 = pnand %p1518_p2, %p2451_p11  ;;  %p1526_p10 = scmp.lt.u32.totalorder %s1517_s14, %s1919_s20 }
  0x6f   : > { %p1525_p9 = por %p1524_p0, %p1523_p1 }
  0x70   : > { %p1521_p4 = pneg %p1520_p13 }
  0x71   : > { %p1527_p8 = por %p1526_p10, %p1525_p9 }
  0x73   : > { %p1528_p7 = pnand %p1527_p8, %p1521_p4 }
  0x75   : > { %1531 = shalt.err (!%p1528_p7)
}
  0x76   : > { %s1532_s19 = scalar_lea.vmem %s1953_s23, 768  ;;  %p2452_p3 = pmov %p2451_p11 }
  0x77   : > { %p1533_p6 = scmp.ne.s32.totalorder %s1953_s23, %s1532_s19  ;;  %s1679_s27 = smov [#allocation9]  }
  0x78   : > { %s1537_s5 = sshll.u32 %s1679_s27, 4  ;;  %s1538_s5 = int_to_ptr.vmem [resolvable:$false] %s1537_s5 }
  0x79   : > { %p1535_p12 = pnand %p1533_p6, %p2452_p3  ;;  %s1539_s18 = scalar_lea.vmem %s1538_s5, 1536 }
  0x7a   : > { %p1540_p11 = scmp.lt.s32.totalorder %s1953_s23, %s1538_s5  ;;  %p1541_p13 = scmp.lt.s32.totalorder %s1539_s18, %s1532_s19 }
  0x7b   : > { %p1536_p2 = pneg %p1535_p12 }
  0x7c   : > { %p1542_p1 = por %p1541_p13, %p1540_p11 }
  0x7e   : > { %p1543_p0 = pnand %p1542_p1, %p1536_p2 }
  0x80   : > { %1546 = shalt.err (!%p1543_p0)
}
  0x81   : > { %1332 = dma.hbm_to_vmem [thread:$0]  (!%p1781_p5), %s1919_s20, 768, %s1953_s23, %s1796_s8, %s2450_s9, %s2450_s9, %s2449_s7  }
  0x82   : > { %p2453_p4 = scmp.ne.s32.totalorder %s2431_s30, 0 }
  0x83   : > { %s1985_s6 = sand.u32 (!%p2453_p4), 1, %s1649_s16   ;;  %p2454_p9 = scmp.ne.s32.totalorder (!%p2453_p4), %s2435_s11, 0 }
  0x84   : > { %227 = sbr.rel (%p2453_p4) target bundleno = 1190 (0x4a6), region = 32  ;;  %s230_s3 = scalar_lea.sflag (!%p2453_p4), [#allocation5], %s1985_s6 }
  0x85   : > { %s1303_s10 = smul.u32 (!%p2453_p4), 48, %s1985_s6 }
  0x87   : > { %s1989_s14 = scalar_lea.vmem (!%p2453_p4), [#allocation4], %s1303_s10 }
  0x8b   : > { %1620 = dma.done.wait (%p2454_p9), %s230_s3, 768  }
  0x8c   : > { %1622 = vsyncadd (%p2454_p9), %s230_s3, 4294966528  ;;  %s2455_s20 = sld [smem:[#allocation20_spill]]  ;;  %s238_s29 = sand.u32 1, %s1835_s4  }
  0x8d   : > { %s240_s8 = sand.u32 1, %s1637_s13   ;;  %s239_s7 = scalar_lea.sflag [#allocation8], %s238_s29 }
  0x8e   : > { %s1304_s30 = smul.u32 48, %s240_s8 }
  0x90   : > { %s1997_s9 = scalar_lea.vmem [#allocation7], %s1304_s30 }
  0x92   : > { %p2456_p5 = scmp.ne.s32.totalorder %s2455_s20, 0 }
  0x94   : > { %1624 = dma.done.wait (%p2456_p5), %s239_s7, 1536  }
  0x95   : > { %1626 = vsyncadd (%p2456_p5), %s239_s7, 4294965760  ;;  %s1289_s23 = sshll.u32 %s1985_s6, 3  ;;  %s2004_s25 = scalar_lea.vmem [#allocation9], %s1304_s30 }
  0x96   : > { %s2006_s11 = scalar_lea.vmem [#allocation10], %s1289_s23  ;;  %s2457_s17 = sld [smem:[#allocation16_spill]] }
  0x9c   : > { %p1290_p10 = scmp.ne.s32.totalorder %s2457_s17, 0 }
  0x9d   : > { %vm289_vm0 = vcmask (!%p1290_p10), 138240   ;;  %v298_v0 = vld [vmem:[%s1997_s9] sm:$0xff] (!%p1290_p10)  ;;  %v300_v1 = vld [vmem:[%s1997_s9 + $0x10] sm:$0xff] (!%p1290_p10)  ;;  %v1680_v3 = vmov (!%p1290_p10), 0.0   ;;  %vm296_vm1 = vcmask (!%p1290_p10), 131072   ;;  %v299_v14 = vld [vmem:[%s1997_s9 + $0x8] sm:$0xff] (!%p1290_p10) }
  0x9e   : > { %287 = sbr.rel (%p1290_p10) target bundleno = 567 (0x237), region = 48  ;;  %v302_v2 = vld [vmem:[%s1997_s9 + $0x20] sm:$0xff] (!%p1290_p10)  ;;  %290 = vst.msk [vmem:[#allocation2 + $0x8] sm:$0xff] (!%p1290_p10), %vm289_vm0, %v1680_v3  ;;  %292 = vst.msk [vmem:[#allocation2 + $0x18] sm:$0xff] (!%p1290_p10), %vm289_vm0, %v1680_v3  ;;  %v304_v4 = vmul.f32 (!%p1290_p10), 0.299, %v298_v0 }
  0x9f   : > { %v306_v5 = vmul.f32 (!%p1290_p10), 0.587, %v300_v1  ;;  %v310_v6 = vmul.f32 (!%p1290_p10), 0.114, %v302_v2  ;;  %288 = vst [vmem:[#allocation2] sm:$0xff] (!%p1290_p10), %v1680_v3  ;;  %291 = vst [vmem:[#allocation2 + $0x10] sm:$0xff] (!%p1290_p10), %v1680_v3 }
  0xa0   : > { %293 = vst [vmem:[#allocation2 + $0x20] sm:$0xff] (!%p1290_p10), %v1680_v3  ;;  %294 = vst.msk [vmem:[#allocation2 + $0x28] sm:$0xff] (!%p1290_p10), %vm289_vm0, %v1680_v3  ;;  %v318_v7 = vld [vmem:[%s2004_s25] sm:$0xff] (!%p1290_p10)  ;;  %v320_v8 = vld [vmem:[%s2004_s25 + $0x10] sm:$0xff] (!%p1290_p10)  ;;  %v305_v19 = vmul.f32 (!%p1290_p10), 0.299, %v299_v14 }
  0xa1   : > { %295 = vst [vmem:[#allocation2 + $0x30] sm:$0x1] (!%p1290_p10), %v1680_v3  ;;  %v322_v9 = vld [vmem:[%s2004_s25 + $0x20] sm:$0xff] (!%p1290_p10)  ;;  %v308_v10 = vadd.f32 (!%p1290_p10), %v306_v5, %v304_v4  ;;  %v324_v11 = vmul.f32 (!%p1290_p10), 0.299, %v318_v7  ;;  %v301_v15 = vld [vmem:[%s1997_s9 + $0x18] sm:$0xff] (!%p1290_p10) }
  0xa2   : > { %v326_v12 = vmul.f32 (!%p1290_p10), 0.587, %v320_v8  ;;  %v330_v13 = vmul.f32 (!%p1290_p10), 0.114, %v322_v9  ;;  %297 = vst.msk [vmem:[#allocation2 + $0x38] sm:$0x1] (!%p1290_p10), %vm296_vm1, %v1680_v3 }
  0xa3   : > { %v303_v16 = vld [vmem:[%s1997_s9 + $0x28] sm:$0xff] (!%p1290_p10)  ;;  %v312_v17 = vadd.f32 (!%p1290_p10), %v310_v6, %v308_v10  ;;  %v307_v20 = vmul.f32 (!%p1290_p10), 0.587, %v301_v15  ;;  %v321_v22 = vld [vmem:[%s2004_s25 + $0x18] sm:$0xff] (!%p1290_p10)  ;;  %vm360_vm2 = vcmask (!%p1290_p10), 130048   ;;  %v2033_v41 = vrot.slane (!%p1290_p10), %v1680_v3, 2 }
  0xa4   : > { %v328_v18 = vadd.f32 (!%p1290_p10), %v326_v12, %v324_v11  ;;  %v319_v21 = vld [vmem:[%s2004_s25 + $0x8] sm:$0xff] (!%p1290_p10)  ;;  %v311_v23 = vmul.f32 (!%p1290_p10), 0.114, %v303_v16  ;;  %v327_v29 = vmul.f32 (!%p1290_p10), 0.587, %v321_v22  ;;  %vm433_vm3 = vcmask (!%p1290_p10), 1045504  }
  0xa5   : > { %v323_v24 = vld [vmem:[%s2004_s25 + $0x28] sm:$0xff]  ;;  %v325_v25 = vmul.f32 0.299, %v319_v21  ;;  %v314_v26 = vmax.f32 %v312_v17, 0.0  ;;  %v309_v28 = vadd.f32 %v307_v20, %v305_v19  ;;  %s1681_s4 = smov 126   ;;  %s1682_s1 = smov 127  }
  0xa6   : > { %v332_v27 = vadd.f32 %v330_v13, %v328_v18  ;;  %v331_v30 = vmul.f32 0.114, %v323_v24  ;;  %v2043_v61 = vld [vmem:[#allocation2 + $0x8] sm:$0xff]  ;;  %s1683_s24 = smov 2   ;;  %vm397_vm4 = vcmask 15360   ;;  %vm411_vm5 = vcmask 1046528  }
  0xa7   : > { %v316_v31 = vmin.f32 %v314_v26, 1.0  ;;  %v313_v35 = vadd.f32 %v311_v23, %v309_v28  ;;  %v329_v36 = vadd.f32 %v327_v29, %v325_v25  ;;  %vm725_vm6 = vcmask 130055  }
  0xa8   : > { %v334_v32 = vsub.f32 %v318_v7, %v332_v27  ;;  %v344_v33 = vsub.f32 %v322_v9, %v332_v27  ;;  %v354_v34 = vmax.f32 %v332_v27, 0.0  ;;  %v2029_v37 = vld [vmem:[#allocation2 + $0x30] sm:$0x1]  ;;  %vm728_vm7 = vcmask 129024  }
  0xa9   : > { %369 = vst.msk [vmem:[#allocation2 + $0x18] sm:$0xff] %vm360_vm2, %v316_v31  ;;  %v315_v42 = vmax.f32 %v313_v35, 0.0  ;;  %v333_v43 = vadd.f32 %v331_v30, %v329_v36  ;;  %v451_v44 = vrot.slane %v2029_v37, 2  ;;  %v2051_v4 = vld [vmem:[#allocation2 + $0x38] sm:$0x1] }
  0xaa   : > { %v336_v38 = vmul.f32 0.713, %v334_v32  ;;  %v346_v39 = vmul.f32 0.564, %v344_v33  ;;  %v356_v40 = vmin.f32 %v354_v34, 1.0  ;;  %v453_v10 = vrot.slane %v2051_v4, 2 }
  0xab   : > { %v317_v48 = vmin.f32 %v315_v42, 1.0  ;;  %v335_v49 = vsub.f32 %v319_v21, %v333_v43  ;;  %v345_v50 = vsub.f32 %v323_v24, %v333_v43  ;;  %v355_v51 = vmax.f32 %v333_v43, 0.0  ;;  %v2074_v18 = vld [vmem:[#allocation2 + $0x38] sm:$0x1]  ;;  %v550_v22 = vld [vmem:[#allocation2 + $0x30] sm:$0x1] }
  0xac   : > { %v338_v45 = vadd.f32 0.5, %v336_v38  ;;  %v348_v46 = vadd.f32 0.5, %v346_v39  ;;  %v358_v47 = vmax.f32 %v316_v31, %v356_v40  ;;  %v2039_v54 = vsel %vm433_vm3, %v2033_v41, %v451_v44 }
  0xad   : > { %v337_v55 = vmul.f32 0.713, %v335_v49  ;;  %v347_v56 = vmul.f32 0.564, %v345_v50  ;;  %v357_v57 = vmin.f32 %v355_v51, 1.0  ;;  %370 = vst.msk [vmem:[#allocation2 + $0x28] sm:$0xff] %vm360_vm2, %v317_v48  ;;  %v1447_v39 = vpack.i.bf16 %v550_v22, %v2029_v37 }
  0xae   : > { %v340_v52 = vmax.f32 %v338_v45, 0.0  ;;  %v350_v53 = vmax.f32 %v348_v46, 0.0  ;;  %361 = vst.msk [vmem:[#allocation3] sm:$0xff] %vm360_vm2, %v358_v47  ;;  %v465_v58 = vsub.f32 0.0, %v2039_v54  ;;  %v623_v23 = vrot.slane %v2074_v18, 2 }
  0xaf   : > { %v339_v63 = vadd.f32 0.5, %v337_v55  ;;  %v349_v0 = vadd.f32 0.5, %v347_v56  ;;  %v359_v1 = vmax.f32 %v317_v48, %v357_v57  ;;  %v621_v24 = vrot.slane %v550_v22, 2 }
  0xb0   : > { %v342_v59 = vmin.f32 %v340_v52, 1.0  ;;  %v352_v60 = vmin.f32 %v350_v53, 1.0  ;;  %v2045_v62 = vld [vmem:[#allocation2 + $0x18] sm:$0xff]  ;;  %v461_v43 = vsub.f32 0.0, %v2033_v41 }
  0xb1   : > { %v446_v2 = vrot.slane %v2045_v62, 2  ;;  %542 = vst.msk [vmem:[#allocation2 + $0x18] sm:$0xff] %vm360_vm2, %v356_v40  ;;  %v341_v5 = vmax.f32 %v339_v63, 0.0  ;;  %v351_v6 = vmax.f32 %v349_v0, 0.0  ;;  %362 = vst.msk [vmem:[#allocation3 + $0x8] sm:$0xff] %vm360_vm2, %v359_v1  ;;  %v2093_v31 = vsel %vm433_vm3, %v2033_v41, %v621_v24 }
  0xb2   : > { %364 = vst.msk [vmem:[#allocation3 + $0x10] sm:$0xff] %vm360_vm2, %v352_v60  ;;  %367 = vst.msk [vmem:[#allocation3 + $0x20] sm:$0xff] %vm360_vm2, %v342_v59  ;;  %v635_v33 = vsub.f32 0.0, %v2093_v31 }
  0xb3   : > { %v2055_v7 = vsub.f32 %v2043_v61, %v446_v2  ;;  %v343_v8 = vmin.f32 %v341_v5, 1.0  ;;  %v353_v9 = vmin.f32 %v351_v6, 1.0 }
  0xb4   : > { %v2060_v11 = vld [vmem:[#allocation2 + $0x28] sm:$0xff] }
  0xb5   : > { %491 = vrot.lane.b32.xlu0 %v2055_v7, %s1681_s4  ;;  %365 = vst.msk [vmem:[#allocation3 + $0x18] sm:$0xff] %vm360_vm2, %v353_v9  ;;  %368 = vst.msk [vmem:[#allocation3 + $0x28] sm:$0xff] %vm360_vm2, %v343_v8  ;;  %v449_v12 = vrot.slane %v2060_v11, 2  ;;  %v467_v20 = vmul.f32 2.0, %v2055_v7 }
  0xb6   : > { %543 = vst.msk [vmem:[#allocation2 + $0x28] sm:$0xff] %vm360_vm2, %v357_v57 }
  0xb7   : > { %v450_v13 = vsel %vm433_vm3, %v446_v2, %v449_v12  ;;  %v454_v14 = vsel %vm433_vm3, %v449_v12, %v453_v10 }
  0xb8   : > { %v2068_v15 = vld [vmem:[#allocation2 + $0x18] sm:$0xff]  ;;  %v2071_v16 = vsub.f32 %v2045_v62, %v450_v13  ;;  %v466_v17 = vsub.f32 %v2060_v11, %v454_v14 }
  0xb9   : > { %v616_v21 = vrot.slane %v2068_v15, 2 }
  0xba   : > { %493 = vrot.lane.b32.xlu1 %v2071_v16, %s1681_s4  ;;  %495 = vrot.lane.b32.xlu0 %v466_v17, %s1681_s4  ;;  %v469_v19 = vmul.f32 2.0, %v466_v17  ;;  %v468_v28 = vmul.f32 2.0, %v2071_v16 }
  0xbb   : > { %v632_v27 = vsub.f32 %v2043_v61, %v616_v21 }
  0xbd   : > { %v2082_v25 = vld [vmem:[#allocation2 + $0x28] sm:$0xff]  ;;  %v637_v34 = vmul.f32 2.0, %v632_v27 }
  0xbe   : > { %v619_v26 = vrot.slane %v2082_v25, 2  ;;  %477 = vrot.lane.b32.xlu1 %v469_v19, %s1682_s1  ;;  %473 = vrot.lane.b32.xlu0 %v467_v20, %s1682_s1 }
  0xc0   : > { %v620_v29 = vsel %vm433_vm3, %v616_v21, %v619_v26  ;;  %v624_v30 = vsel %vm433_vm3, %v619_v26, %v623_v23 }
  0xc1   : > { %v2096_v32 = vsub.f32 %v2068_v15, %v620_v29  ;;  %v2103_v36 = vsub.f32 %v2082_v25, %v624_v30 }
  0xc2   : > { %661 = vrot.lane.b32.xlu1 %v632_v27, %s1681_s4  ;;  %475 = vrot.lane.b32.xlu0 %v468_v28, %s1682_s1 }
  0xc3   : > { %v638_v35 = vmul.f32 2.0, %v2096_v32  ;;  %v639_v38 = vmul.f32 2.0, %v2103_v36 }
  0xc6   : > { %643 = vrot.lane.b32.xlu1 %v637_v34, %s1682_s1  ;;  %645 = vrot.lane.b32.xlu0 %v638_v35, %s1682_s1 }
  0xca   : > { %647 = vrot.lane.b32.xlu1 %v639_v38, %s1682_s1  ;;  %663 = vrot.lane.b32.xlu0 %v2096_v32, %s1681_s4 }
  0xce   : > { %665 = vrot.lane.b32.xlu1 %v2103_v36, %s1681_s4  ;;  %1438 = vrot.lane.b32.xlu0 %v1680_v3, %s1683_s24 }
  0xd2   : > { %391 = vrot.lane.b32.xlu1 %v2045_v62, %s1683_s24  ;;  %395 = vrot.lane.b32.xlu0 %v2060_v11, %s1683_s24 }
  0xd6   : > { %1443 = vrot.lane.b32.xlu1 %v1680_v3, %s1683_s24  ;;  %564 = vrot.lane.b32.xlu0 %v2068_v15, %s1683_s24 }
  0xda   : > { %568 = vrot.lane.b32.xlu1 %v2082_v25, %s1683_s24  ;;  %1448 = vrot.lane.b32.xlu0 %v1447_v39, %s1683_s24 }
  0xde   : > { %425 = vrot.lane.b32.xlu1 %v2051_v4, %s1683_s24  ;;  %596 = vrot.lane.b32.xlu0 %v2074_v18, %s1683_s24 }
  0xe2   : > { %1453 = vrot.lane.b32.xlu1 %v1680_v3, %s1683_s24  ;;  %387 = vrot.lane.b32.xlu0 %v2043_v61, %s1683_s24 }
  0xe6   : > { %560 = vrot.lane.b32.xlu1 %v2043_v61, %s1683_s24 }
 0x127   : > { %v492_v37 = vpop.permute.xlu0 %491 }
 0x12c   : > { %v494_v40 = vpop.permute.xlu1 %493  ;;  %v496_v42 = vpop.permute.xlu0 %495 }
 0x130   : > { %v478_v44 = vpop.permute.xlu1 %477  ;;  %v474_v45 = vpop.permute.xlu0 %473 }
 0x131   : > { %v482_v46 = vadd.f32 %v474_v45, %v461_v43  ;;  %v483_v47 = vadd.f32 %v474_v45, %v2055_v7  ;;  %v486_v3 = vadd.f32 %v478_v44, %v465_v58  ;;  %v487_v50 = vadd.f32 %v478_v44, %v466_v17 }
 0x133   : > { %v500_v48 = vadd.f32 %v492_v37, %v482_v46  ;;  %v501_v49 = vadd.f32 %v492_v37, %v483_v47  ;;  %v504_v60 = vadd.f32 %v496_v42, %v486_v3  ;;  %v505_v63 = vadd.f32 %v496_v42, %v487_v50 }
 0x134   : > { %v662_v51 = vpop.permute.xlu1 %661  ;;  %v476_v52 = vpop.permute.xlu0 %475 }
 0x135   : > { %v484_v53 = vadd.f32 %v476_v52, %v461_v43  ;;  %v485_v55 = vadd.f32 %v476_v52, %v2071_v16  ;;  %v510_v56 = vand.u32 2147483647, %v501_v49  ;;  %v509_v57 = vand.u32 2147483647, %v500_v48 }
 0x136   : > { %v514_v6 = vand.u32 2147483647, %v505_v63  ;;  %v513_v7 = vand.u32 2147483647, %v504_v60 }
 0x137   : > { %v502_v59 = vadd.f32 %v494_v40, %v484_v53  ;;  %v503_v41 = vadd.f32 %v494_v40, %v485_v55  ;;  %523 = vrot.lane.b32.xlu1 %v510_v56, %s1683_s24  ;;  %521 = vrot.lane.b32.xlu0 %v509_v57, %s1683_s24 }
 0x138   : > { %v644_v0 = vpop.permute.xlu1 %643  ;;  %v646_v1 = vpop.permute.xlu0 %645 }
 0x139   : > { %v652_v54 = vadd.f32 %v644_v0, %v461_v43  ;;  %v653_v58 = vadd.f32 %v644_v0, %v632_v27  ;;  %v512_v2 = vand.u32 2147483647, %v503_v41  ;;  %v511_v5 = vand.u32 2147483647, %v502_v59 }
 0x13a   : > { %v654_v12 = vadd.f32 %v646_v1, %v461_v43  ;;  %v655_v13 = vadd.f32 %v646_v1, %v2096_v32 }
 0x13b   : > { %527 = vrot.lane.b32.xlu1 %v512_v2, %s1683_s24  ;;  %525 = vrot.lane.b32.xlu0 %v511_v5, %s1683_s24  ;;  %v670_v9 = vadd.f32 %v662_v51, %v652_v54  ;;  %v671_v10 = vadd.f32 %v662_v51, %v653_v58 }
 0x13c   : > { %v648_v8 = vpop.permute.xlu1 %647  ;;  %v664_v14 = vpop.permute.xlu0 %663 }
 0x13d   : > { %v656_v16 = vadd.f32 %v648_v8, %v635_v33  ;;  %v657_v17 = vadd.f32 %v648_v8, %v2103_v36  ;;  %v672_v19 = vadd.f32 %v664_v14, %v654_v12  ;;  %v673_v20 = vadd.f32 %v664_v14, %v655_v13 }
 0x13e   : > { %v680_v21 = vand.u32 2147483647, %v671_v10  ;;  %v679_v22 = vand.u32 2147483647, %v670_v9 }
 0x13f   : > { %531 = vrot.lane.b32.xlu1 %v514_v6, %s1683_s24  ;;  %529 = vrot.lane.b32.xlu0 %v513_v7, %s1683_s24  ;;  %v681_v24 = vand.u32 2147483647, %v672_v19  ;;  %v682_v26 = vand.u32 2147483647, %v673_v20 }
 0x140   : > { %v666_v23 = vpop.permute.xlu1 %665  ;;  %v1439_v31 = vpop.permute.xlu0 %1438 }
 0x141   : > { %v674_v27 = vadd.f32 %v666_v23, %v656_v16  ;;  %v675_v28 = vadd.f32 %v666_v23, %v657_v17  ;;  %v1440_v37 = vunpack.i.l.bf16 %v1439_v31  ;;  %v1441_v40 = vunpack.i.h.bf16 %v1439_v31 }
 0x143   : > { %693 = vrot.lane.b32.xlu1 %v680_v21, %s1683_s24  ;;  %691 = vrot.lane.b32.xlu0 %v679_v22, %s1683_s24  ;;  %v683_v29 = vand.u32 2147483647, %v674_v27  ;;  %v684_v30 = vand.u32 2147483647, %v675_v28 }
 0x144   : > { %v392_v32 = vpop.permute.xlu1 %391  ;;  %v396_v33 = vpop.permute.xlu0 %395 }
 0x145   : > { %v399_v43 = vsel %vm397_vm4, %v1440_v37, %v392_v32  ;;  %v400_v44 = vsel %vm397_vm4, %v1441_v40, %v396_v33 }
 0x146   : > { %v405_v46 = vsub.f32 %v2045_v62, %v399_v43  ;;  %v406_v47 = vsub.f32 %v2060_v11, %v400_v44 }
 0x147   : > { %697 = vrot.lane.b32.xlu1 %v682_v26, %s1683_s24  ;;  %695 = vrot.lane.b32.xlu0 %v681_v24, %s1683_s24 }
 0x148   : > { %v1444_v34 = vpop.permute.xlu1 %1443  ;;  %v565_v35 = vpop.permute.xlu0 %564  ;;  %v407_v3 = vmul.f32 2.0, %v405_v46  ;;  %v408_v50 = vmul.f32 2.0, %v406_v47  ;;  %v435_v11 = vrot.slane %v406_v47, 2  ;;  %v434_v1 = vrot.slane %v405_v46, 2 }
 0x149   : > { %v1445_v51 = vunpack.i.l.bf16 %v1444_v34  ;;  %v1446_v53 = vunpack.i.h.bf16 %v1444_v34 }
 0x14a   : > { %v412_v57 = vrot.slane %v407_v3, 1  ;;  %v413_v59 = vrot.slane %v408_v50, 1  ;;  %v436_v14 = vsel %vm433_vm3, %v434_v1, %v435_v11 }
 0x14b   : > { %701 = vrot.lane.b32.xlu1 %v684_v30, %s1683_s24  ;;  %699 = vrot.lane.b32.xlu0 %v683_v29, %s1683_s24  ;;  %v571_v41 = vsel %vm397_vm4, %v1445_v51, %v565_v35 }
 0x14c   : > { %v569_v36 = vpop.permute.xlu1 %568  ;;  %v1449_v38 = vpop.permute.xlu0 %1448  ;;  %v577_v63 = vsub.f32 %v2068_v15, %v571_v41  ;;  %v414_v5 = vsel %vm411_vm5, %v412_v57, %v413_v59  ;;  %v420_v16 = vadd.f32 %v413_v59, %v406_v47 }
 0x14d   : > { %v1450_v55 = vunpack.i.l.bf16 %v1449_v38  ;;  %v572_v60 = vsel %vm397_vm4, %v1446_v53, %v569_v36  ;;  %v419_v9 = vadd.f32 %v414_v5, %v405_v46  ;;  %v1451_v15 = vunpack.i.h.bf16 %v1449_v38 }
 0x14e   : > { %v578_v54 = vsub.f32 %v2082_v25, %v572_v60  ;;  %v579_v7 = vmul.f32 2.0, %v577_v63 }
 0x14f   : > { %v443_v21 = vadd.f32 %v436_v14, %v419_v9 }
 0x150   : > { %v426_v39 = vpop.permute.xlu1 %425  ;;  %v597_v42 = vpop.permute.xlu0 %596  ;;  %v580_v10 = vmul.f32 2.0, %v578_v54  ;;  %v583_v17 = vrot.slane %v579_v7, 1  ;;  %v605_v33 = vrot.slane %v578_v54, 2 }
 0x151   : > { %v427_v62 = vsel %vm397_vm4, %v1450_v55, %v426_v39  ;;  %v598_v26 = vsel %vm397_vm4, %v1451_v15, %v597_v42  ;;  %v507_v30 = vand.u32 2147483647, %v443_v21 }
 0x152   : > { %v429_v58 = vsub.f32 %v2051_v4, %v427_v62  ;;  %v584_v22 = vrot.slane %v580_v10, 1  ;;  %v600_v34 = vsub.f32 %v2074_v18, %v598_v26 }
 0x154   : > { %v1454_v45 = vpop.permute.xlu1 %1453  ;;  %v388_v49 = vpop.permute.xlu0 %387  ;;  %v437_v12 = vrot.slane %v429_v58, 2  ;;  %v585_v36 = vsel %vm411_vm5, %v583_v17, %v584_v22  ;;  %v607_v44 = vrot.slane %v600_v34, 2  ;;  %v591_v50 = vadd.f32 %v584_v22, %v578_v54 }
 0x155   : > { %v1455_v48 = vunpack.i.l.bf16 %v1454_v45  ;;  %v1456_v2 = vunpack.i.h.bf16 %v1454_v45  ;;  %v590_v43 = vadd.f32 %v585_v36, %v577_v63 }
 0x156   : > { %v438_v24 = vsel %vm433_vm3, %v435_v11, %v437_v12 }
 0x157   : > { %v398_v52 = vsel %vm397_vm4, %v1455_v48, %v388_v49  ;;  %v444_v32 = vadd.f32 %v438_v24, %v420_v16 }
 0x158   : > { %v404_v56 = vsub.f32 %v2043_v61, %v398_v52  ;;  %v561_v6 = vpop.permute.xlu1 %560  ;;  %v608_v52 = vsel %vm433_vm3, %v605_v33, %v607_v44 }
 0x159   : > { %v570_v13 = vsel %vm397_vm4, %v1456_v2, %v561_v6  ;;  %v508_v37 = vand.u32 2147483647, %v444_v32  ;;  %v614_v41 = vadd.f32 %v608_v52, %v591_v50 }
 0x15a   : > { %v418_v0 = vadd.f32 %v412_v57, %v404_v56  ;;  %v576_v25 = vsub.f32 %v2043_v61, %v570_v13  ;;  %v604_v61 = vrot.slane %v577_v63, 2 }
 0x15b   : > { %v678_v63 = vand.u32 2147483647, %v614_v41 }
 0x15c   : > { %v442_v8 = vadd.f32 %v434_v1, %v418_v0  ;;  %v589_v28 = vadd.f32 %v583_v17, %v576_v25  ;;  %v606_v46 = vsel %vm433_vm3, %v604_v61, %v605_v33 }
 0x15d   : > { %v613_v3 = vadd.f32 %v606_v46, %v590_v43 }
 0x15e   : > { %v506_v4 = vand.u32 2147483647, %v442_v8  ;;  %v612_v42 = vadd.f32 %v604_v61, %v589_v28 }
 0x15f   : > { %v677_v56 = vand.u32 2147483647, %v613_v3 }
 0x160   : > { %v676_v18 = vand.u32 2147483647, %v612_v42 }
 0x1a9   : > { %v524_v19 = vpop.permute.xlu1 %523  ;;  %v522_v20 = vpop.permute.xlu0 %521 }
 0x1aa   : > { %v533_v23 = vsel %vm397_vm4, %v522_v20, %v524_v19 }
 0x1ab   : > { %v539_v27 = vadd.f32 %v533_v23, %v506_v4 }
 0x1ad   : > { %v528_v29 = vpop.permute.xlu1 %527  ;;  %715 = vrot.lane.b32.xlu0 %v539_v27, %s1682_s1  ;;  %v526_v31 = vpop.permute.xlu0 %525 }
 0x1ae   : > { %v534_v35 = vsel %vm397_vm4, %v526_v31, %v528_v29 }
 0x1af   : > { %v540_v38 = vadd.f32 %v534_v35, %v507_v30 }
 0x1b1   : > { %v532_v39 = vpop.permute.xlu1 %531  ;;  %717 = vrot.lane.b32.xlu1 %v540_v38, %s1682_s1  ;;  %v530_v40 = vpop.permute.xlu0 %529 }
 0x1b2   : > { %v535_v45 = vsel %vm397_vm4, %v530_v40, %v532_v39 }
 0x1b3   : > { %v541_v47 = vadd.f32 %v535_v45, %v508_v37 }
 0x1b5   : > { %v694_v48 = vpop.permute.xlu1 %693  ;;  %719 = vrot.lane.b32.xlu0 %v541_v47, %s1682_s1  ;;  %v692_v49 = vpop.permute.xlu0 %691 }
 0x1b6   : > { %v703_v51 = vsel %vm397_vm4, %v692_v49, %v694_v48 }
 0x1b7   : > { %v709_v53 = vadd.f32 %v703_v51, %v676_v18 }
 0x1b9   : > { %v698_v55 = vpop.permute.xlu1 %697  ;;  %v696_v57 = vpop.permute.xlu0 %695  ;;  %v730_v59 = vmax.f32 %v539_v27, %v709_v53 }
 0x1ba   : > { %v704_v60 = vsel %vm397_vm4, %v696_v57, %v698_v55 }
 0x1bb   : > { %v710_v62 = vadd.f32 %v704_v60, %v677_v56  ;;  %736 = vrot.lane.b32.xlu1 %v730_v59, %s1682_s1 }
 0x1bd   : > { %v702_v11 = vpop.permute.xlu1 %701  ;;  %v700_v0 = vpop.permute.xlu0 %699  ;;  %v731_v1 = vmax.f32 %v540_v38, %v710_v62 }
 0x1be   : > { %v705_v54 = vsel %vm397_vm4, %v700_v0, %v702_v11 }
 0x1bf   : > { %v711_v58 = vadd.f32 %v705_v54, %v678_v63  ;;  %738 = vrot.lane.b32.xlu0 %v731_v1, %s1682_s1 }
 0x1c1   : > { %v732_v2 = vmax.f32 %v541_v47, %v711_v58 }
 0x1c3   : > { %740 = vrot.lane.b32.xlu1 %v732_v2, %s1682_s1 }
 0x21f   : > { %v716_v5 = vpop.permute.xlu0 %715 }
 0x220   : > { %726 = vst.msk [vmem:[#allocation3 + $0x29] sm:$0x80] %vm725_vm6, %v716_v5 }
 0x223   : > { %v718_v6 = vpop.permute.xlu1 %717 }
 0x224   : > { %727 = vst.msk [vmem:[#allocation3 + $0x31] sm:$0xff] %vm360_vm2, %v718_v6 }
 0x227   : > { %v720_v7 = vpop.permute.xlu0 %719 }
 0x228   : > { %729 = vst.msk [vmem:[#allocation3 + $0x39] sm:$0x7f] %vm728_vm7, %v720_v7 }
 0x22d   : > { %v737_v8 = vpop.permute.xlu1 %736 }
 0x22e   : > { %746 = vst.msk [vmem:[#allocation3 + $0x39] sm:$0x80] %vm725_vm6, %v737_v8 }
 0x231   : > { %v739_v9 = vpop.permute.xlu0 %738 }
 0x232   : > { %747 = vst.msk [vmem:[#allocation3 + $0x41] sm:$0xff] %vm360_vm2, %v739_v9 }
 0x235   : > { %v741_v10 = vpop.permute.xlu1 %740 }
 0x236   : > { %748 = vst.msk [vmem:[#allocation3 + $0x49] sm:$0x7f] %vm728_vm7, %v741_v10 }
 0x237 PF: > { %v2195_v12 = vld [vmem:[%s1989_s14] sm:$0xff]  ;;  %v751_v13 = vld [vmem:[%s1989_s14 + $0x10] sm:$0xff]  ;;  %v2204_v25 = vld [vmem:[%s1989_s14 + $0x8] sm:$0xff]  ;;  %vm795_vm8 = vcmask 130048   ;;  %vm910_vm9 = vcmask 1045504   ;;  %s1684_s28 = smov 126  }
 0x238   : > { %v2199_v14 = vld [vmem:[%s1989_s14 + $0x20] sm:$0xff]  ;;  %v755_v15 = vmul.f32 0.299, %v2195_v12  ;;  %v757_v16 = vmul.f32 0.587, %v751_v13  ;;  %v752_v19 = vld [vmem:[%s1989_s14 + $0x18] sm:$0xff] }
 0x239   : > { %v761_v17 = vmul.f32 0.114, %v2199_v14  ;;  %v2208_v20 = vld [vmem:[%s1989_s14 + $0x28] sm:$0xff]  ;;  %v756_v21 = vmul.f32 0.299, %v2204_v25  ;;  %v2211_v23 = vld [vmem:[#allocation2 + $0x10] sm:$0xff] }
 0x23a   : > { %v759_v4 = vadd.f32 %v757_v16, %v755_v15  ;;  %v758_v22 = vmul.f32 0.587, %v752_v19  ;;  %v762_v24 = vmul.f32 0.114, %v2208_v20  ;;  %v922_v26 = vrot.slane %v2211_v23, 2  ;;  %v848_v29 = vld [vmem:[#allocation2] sm:$0xff] }
 0x23b   : > { %v2222_v61 = vld [vmem:[#allocation2 + $0x20] sm:$0xff]  ;;  %v854_v38 = vld [vmem:[#allocation2 + $0x30] sm:$0x1]  ;;  %v2236_v42 = vld [vmem:[#allocation2 + $0x38] sm:$0x1]  ;;  %s1685_s19 = smov 127  }
 0x23c   : > { %v2215_v27 = vadd.f32 %v761_v17, %v759_v4  ;;  %v760_v28 = vadd.f32 %v758_v22, %v756_v21  ;;  %v2217_v30 = vsub.f32 %v848_v29, %v922_v26  ;;  %v924_v35 = vrot.slane %v2222_v61, 2  ;;  %v2240_v45 = vld [vmem:[#allocation2 + $0x8] sm:$0xff]  ;;  %s1686_s27 = smov 2   ;;  %v1020_v59 = vld [vmem:[#allocation3 + $0x40] sm:$0xff]  ;;  %v1070_v63 = vld [vmem:[#allocation3 + $0x30] sm:$0xff]  ;;  %s1687_s5 = smov 1  }
 0x23d   : > { %v928_v39 = vrot.slane %v854_v38, 2  ;;  %v930_v48 = vrot.slane %v2236_v42, 2  ;;  %v1021_v41 = vld [vmem:[#allocation3 + $0x48] sm:$0xff]  ;;  %v1024_v60 = vrot.slane %v1020_v59, 1  ;;  %vm888_vm10 = vcmask 1046528   ;;  %s2458_s18 = sld [smem:[#allocation17_spill]] }
 0x23e   : > { %v785_v31 = vmax.f32 %v2215_v27, 0.0  ;;  %v2220_v32 = vadd.f32 %v762_v24, %v760_v28  ;;  %v925_v37 = vsel %vm910_vm9, %v922_v26, %v924_v35  ;;  %v1025_v62 = vrot.slane %v1021_v41, 1  ;;  %s2459_s10 = sld [smem:[#allocation16_spill]]  ;;  %s1152_s9 = sshll.u32 %s2006_s11, 4  ;;  %s2336_s9 = int_to_ptr.vmem [resolvable:$true] %s1152_s9 }
 0x23f   : > { %v940_v40 = vsub.f32 %v2211_v23, %v925_v37  ;;  %v929_v43 = vsel %vm910_vm9, %v924_v35, %v928_v39  ;;  %v1074_v0 = vrot.slane %v1070_v63, 1  ;;  %vm874_vm11 = vcmask 15360   ;;  %s2460_s4 = sld [smem:[#allocation25_spill]]  ;;  %s1137_s24 = scalar_lea.sflag [#allocation6], %s1985_s6 }
 0x240   : > { %v2224_v33 = vmin.f32 %v785_v31, 1.0  ;;  %v786_v34 = vmax.f32 %v2220_v32, 0.0  ;;  %v942_v44 = vsub.f32 %v2222_v61, %v929_v43  ;;  %v1026_v11 = vsel %vm888_vm10, %v1024_v60, %v1025_v62  ;;  %p2461_p7 = scmp.ne.s32.totalorder %s2440_s26, 0 }
 0x241   : > { %vm1045_vm12 = vcmask 1040384  }
 0x242   : > { %846 = vst.msk [vmem:[#allocation2 + $0x18] sm:$0xff] %vm795_vm8, %v2224_v33  ;;  %v2230_v36 = vmin.f32 %v786_v34, 1.0 }
 0x243   : > { %s1292_s20 = sshll.u32 %s2458_s18, 1 }
 0x244   : > { %847 = vst.msk [vmem:[#allocation2 + $0x28] sm:$0xff] %vm795_vm8, %v2230_v36  ;;  %s1148_s8 = sadd.s32 %s2459_s10, %s1292_s20 }
 0x245   : > { %s1293_s7 = sshll.u32 %s1148_s8, 7 }
 0x246   : > { %s2334_s1 = scalar_lea.hbm %s2460_s4, %s1293_s7 }
 0x249   : > { %v2242_v46 = vld [vmem:[#allocation2 + $0x18] sm:$0xff] }
 0x24a   : > { %v923_v47 = vrot.slane %v2242_v46, 2 }
 0x24b   : > { %v2246_v18 = vld [vmem:[#allocation2 + $0x28] sm:$0xff] }
 0x24c   : > { %v939_v49 = vsub.f32 %v2240_v45, %v923_v47  ;;  %v926_v3 = vrot.slane %v2246_v18, 2 }
 0x24e   : > { %v944_v50 = vmul.f32 2.0, %v939_v49  ;;  %968 = vrot.lane.b32.xlu1 %v939_v49, %s1684_s28  ;;  %v927_v51 = vsel %vm910_vm9, %v923_v47, %v926_v3  ;;  %v931_v52 = vsel %vm910_vm9, %v926_v3, %v930_v48 }
 0x24f   : > { %v941_v53 = vsub.f32 %v2242_v46, %v927_v51  ;;  %v943_v55 = vsub.f32 %v2246_v18, %v931_v52 }
 0x250   : > { %950 = vrot.lane.b32.xlu0 %v944_v50, %s1685_s19 }
 0x251   : > { %v945_v56 = vmul.f32 2.0, %v941_v53  ;;  %v946_v57 = vmul.f32 2.0, %v943_v55 }
 0x253   : > { %954 = vrot.lane.b32.xlu1 %v946_v57, %s1685_s19 }
 0x254   : > { %952 = vrot.lane.b32.xlu0 %v945_v56, %s1685_s19 }
 0x257   : > { %972 = vrot.lane.b32.xlu1 %v943_v55, %s1684_s28 }
 0x258   : > { %970 = vrot.lane.b32.xlu0 %v941_v53, %s1684_s28  ;;  %s1547_s28 = scalar_lea.vmem %s2336_s9, 128 }
 0x259   : > { %p1548_p8 = scmp.ne.s32.totalorder %s2336_s9, %s1547_s28 }
 0x25b   : > { %868 = vrot.lane.b32.xlu1 %v2242_v46, %s1686_s27  ;;  %p1549_p6 = pnand %p1548_p8, %p2461_p7 }
 0x25c   : > { %866 = vrot.lane.b32.xlu0 %v2211_v23, %s1686_s27 }
 0x25d   : > { %p1550_p3 = pneg %p1549_p6 }
 0x25f   : > { %872 = vrot.lane.b32.xlu1 %v2246_v18, %s1686_s27 }
 0x260   : > { %870 = vrot.lane.b32.xlu0 %v2222_v61, %s1686_s27 }
 0x263   : > { %902 = vrot.lane.b32.xlu1 %v2236_v42, %s1686_s27 }
 0x264   : > { %900 = vrot.lane.b32.xlu0 %v854_v38, %s1686_s27 }
 0x267   : > { %864 = vrot.lane.b32.xlu1 %v2240_v45, %s1686_s27 }
 0x268   : > { %862 = vrot.lane.b32.xlu0 %v848_v29, %s1686_s27  ;;  %v1071_v29 = vld [vmem:[#allocation3 + $0x38] sm:$0xff] }
 0x26b   : > { %1029 = vrot.lane.b32.xlu1 %v1026_v11, %s1687_s5 }
 0x26c   : > { %1027 = vrot.lane.b32.xlu0 %v1024_v60, %s1687_s5 }
 0x26f   : > { %1077 = vrot.lane.b32.xlu1 %v1074_v0, %s1687_s5 }
 0x270   : > { %1031 = vrot.lane.b32.xlu0 %v1025_v62, %s1687_s5 }
 0x2c0   : > { %v969_v1 = vpop.permute.xlu1 %968 }
 0x2c2   : > { %v951_v54 = vpop.permute.xlu0 %950 }
 0x2c3   : > { %v959_v58 = vadd.f32 %v951_v54, %v2217_v30  ;;  %v960_v2 = vadd.f32 %v951_v54, %v939_v49  ;;  %v1075_v30 = vrot.slane %v1071_v29, 1 }
 0x2c5   : > { %v977_v5 = vadd.f32 %v969_v1, %v959_v58  ;;  %v978_v6 = vadd.f32 %v969_v1, %v960_v2  ;;  %v955_v7 = vpop.permute.xlu1 %954  ;;  %v1076_v34 = vsel %vm888_vm10, %v1074_v0, %v1075_v30 }
 0x2c6   : > { %v953_v8 = vpop.permute.xlu0 %952  ;;  %v963_v13 = vadd.f32 %v955_v7, %v942_v44  ;;  %v964_v17 = vadd.f32 %v955_v7, %v943_v55 }
 0x2c7   : > { %v986_v9 = vand.u32 2147483647, %v977_v5  ;;  %v987_v10 = vand.u32 2147483647, %v978_v6  ;;  %v961_v15 = vadd.f32 %v953_v8, %v940_v40  ;;  %v962_v16 = vadd.f32 %v953_v8, %v941_v53 }
 0x2c9   : > { %1000 = vrot.lane.b32.xlu1 %v987_v10, %s1686_s27  ;;  %998 = vrot.lane.b32.xlu0 %v986_v9, %s1686_s27  ;;  %v973_v4 = vpop.permute.xlu1 %972 }
 0x2ca   : > { %v971_v19 = vpop.permute.xlu0 %970  ;;  %v981_v26 = vadd.f32 %v973_v4, %v963_v13  ;;  %v982_v28 = vadd.f32 %v973_v4, %v964_v17 }
 0x2cb   : > { %v979_v21 = vadd.f32 %v971_v19, %v961_v15  ;;  %v980_v22 = vadd.f32 %v971_v19, %v962_v16 }
 0x2cc   : > { %v990_v31 = vand.u32 2147483647, %v981_v26  ;;  %v991_v61 = vand.u32 2147483647, %v982_v28 }
 0x2cd   : > { %v988_v23 = vand.u32 2147483647, %v979_v21  ;;  %v989_v24 = vand.u32 2147483647, %v980_v22  ;;  %v869_v35 = vpop.permute.xlu1 %868 }
 0x2ce   : > { %v867_v38 = vpop.permute.xlu0 %866 }
 0x2cf   : > { %1004 = vrot.lane.b32.xlu1 %v989_v24, %s1686_s27  ;;  %1002 = vrot.lane.b32.xlu0 %v988_v23, %s1686_s27  ;;  %v876_v44 = vsel %vm874_vm11, %v867_v38, %v869_v35 }
 0x2d0   : > { %v882_v47 = vsub.f32 %v2242_v46, %v876_v44 }
 0x2d1   : > { %v873_v39 = vpop.permute.xlu1 %872 }
 0x2d2   : > { %v871_v37 = vpop.permute.xlu0 %870  ;;  %v884_v51 = vmul.f32 2.0, %v882_v47  ;;  %v911_v46 = vrot.slane %v882_v47, 2 }
 0x2d3   : > { %1008 = vrot.lane.b32.xlu1 %v991_v61, %s1686_s27  ;;  %1006 = vrot.lane.b32.xlu0 %v990_v31, %s1686_s27  ;;  %v877_v48 = vsel %vm874_vm11, %v871_v37, %v873_v39 }
 0x2d4   : > { %v883_v50 = vsub.f32 %v2246_v18, %v877_v48  ;;  %v889_v55 = vrot.slane %v884_v51, 1 }
 0x2d5   : > { %v903_v40 = vpop.permute.xlu1 %902 }
 0x2d6   : > { %v901_v43 = vpop.permute.xlu0 %900  ;;  %v885_v53 = vmul.f32 2.0, %v883_v50  ;;  %v912_v0 = vrot.slane %v883_v50, 2 }
 0x2d7   : > { %1081 = vrot.lane.b32.xlu1 %v1075_v30, %s1687_s5  ;;  %1079 = vrot.lane.b32.xlu0 %v1076_v34, %s1687_s5  ;;  %v904_v60 = vsel %vm874_vm11, %v901_v43, %v903_v40 }
 0x2d8   : > { %v890_v41 = vrot.slane %v885_v53, 1  ;;  %v906_v1 = vsub.f32 %v2236_v42, %v904_v60  ;;  %v913_v5 = vsel %vm910_vm9, %v911_v46, %v912_v0 }
 0x2d9   : > { %v865_v49 = vpop.permute.xlu1 %864 }
 0x2da   : > { %v863_v3 = vpop.permute.xlu0 %862  ;;  %v891_v18 = vsel %vm888_vm10, %v889_v55, %v890_v41  ;;  %v914_v2 = vrot.slane %v906_v1, 2  ;;  %v897_v10 = vadd.f32 %v890_v41, %v883_v50  ;;  %v766_v41 = vsub.f32 %v2204_v25, %v2220_v32 }
 0x2db   : > { %v875_v52 = vsel %vm874_vm11, %v863_v3, %v865_v49  ;;  %v896_v58 = vadd.f32 %v891_v18, %v882_v47 }
 0x2dc   : > { %v881_v56 = vsub.f32 %v2240_v45, %v875_v52  ;;  %v915_v15 = vsel %vm910_vm9, %v912_v0, %v914_v2 }
 0x2dd   : > { %v1030_v57 = vpop.permute.xlu1 %1029  ;;  %v920_v13 = vadd.f32 %v913_v5, %v896_v58  ;;  %v921_v19 = vadd.f32 %v915_v15, %v897_v10  ;;  %v790_v58 = vld [vmem:[#allocation3 + $0x8] sm:$0xff] }
 0x2de   : > { %v1028_v59 = vpop.permute.xlu0 %1027  ;;  %v895_v62 = vadd.f32 %v889_v55, %v881_v56 }
 0x2df   : > { %v984_v4 = vand.u32 2147483647, %v920_v13  ;;  %v985_v28 = vand.u32 2147483647, %v921_v19  ;;  %v809_v19 = vld [vmem:[#allocation3 + $0x10] sm:$0xff] }
 0x2e0   : > { %v919_v54 = vadd.f32 %v911_v46, %v895_v62  ;;  %v775_v62 = vsub.f32 %v2199_v14, %v2215_v27  ;;  %v776_v46 = vsub.f32 %v2208_v20, %v2220_v32  ;;  %v828_v32 = vld [vmem:[#allocation3 + $0x20] sm:$0xff] }
 0x2e1   : > { %v1078_v11 = vpop.permute.xlu1 %1077 }
 0x2e2   : > { %v1032_v63 = vpop.permute.xlu0 %1031  ;;  %v983_v6 = vand.u32 2147483647, %v919_v54  ;;  %v777_v0 = vmul.f32 0.564, %v775_v62  ;;  %v778_v1 = vmul.f32 0.564, %v776_v46 }
 0x2e4   : > { %v779_v2 = vadd.f32 0.5, %v777_v0  ;;  %v780_v25 = vadd.f32 0.5, %v778_v1 }
 0x2e6   : > { %v781_v14 = vmax.f32 %v779_v2, 0.0 }
 0x2e8   : > { %v783_v15 = vmin.f32 %v781_v14, 1.0 }
 0x33b   : > { %v1001_v45 = vpop.permute.xlu1 %1000  ;;  %v999_v7 = vpop.permute.xlu0 %998 }
 0x33c   : > { %v1010_v8 = vsel %vm874_vm11, %v999_v7, %v1001_v45  ;;  %v792_v7 = vsub.f32 %v2230_v36, %v790_v58 }
 0x33d   : > { %v1016_v9 = vadd.f32 %v1010_v8, %v983_v6 }
 0x33e   : > { %v794_v13 = vand.u32 2147483647, %v792_v7 }
 0x33f   : > { %v1036_v16 = vsub.f32 %v1016_v9, %v1028_v59  ;;  %v1086_v30 = vsub.f32 %v1016_v9, %v1078_v11  ;;  %v765_v59 = vsub.f32 %v2195_v12, %v2215_v27  ;;  %v789_v12 = vld [vmem:[#allocation3] sm:$0xff]  ;;  %v782_v27 = vmax.f32 %v780_v25, 0.0  ;;  %v829_v9 = vld [vmem:[#allocation3 + $0x28] sm:$0xff] }
 0x340   : > { %v791_v6 = vsub.f32 %v2224_v33, %v789_v12  ;;  %v797_v33 = vsel %vm795_vm8, %v794_v13, 0.0 }
 0x341   : > { %v1005_v17 = vpop.permute.xlu1 %1004  ;;  %v1003_v42 = vpop.permute.xlu0 %1002  ;;  %v1039_v23 = vand.u32 2147483647, %v1036_v16  ;;  %v1089_v43 = vand.u32 2147483647, %v1086_v30  ;;  %v767_v11 = vmul.f32 0.713, %v765_v59 }
 0x342   : > { %v1011_v21 = vsel %vm874_vm11, %v1003_v42, %v1005_v17  ;;  %v793_v10 = vand.u32 2147483647, %v791_v6  ;;  %v784_v16 = vmin.f32 %v782_v27, 1.0 }
 0x343   : > { %v1017_v22 = vadd.f32 %v1011_v21, %v984_v4  ;;  %v1046_v35 = vrot.slane %v1039_v23, 7  ;;  %v1095_v52 = vrot.slane %v1089_v43, 7  ;;  %v769_v18 = vadd.f32 0.5, %v767_v11  ;;  %v810_v4 = vld [vmem:[#allocation3 + $0x18] sm:$0xff] }
 0x344   : > { %v796_v21 = vsel %vm795_vm8, %v793_v10, 0.0  ;;  %v812_v36 = vsub.f32 %v784_v16, %v810_v4 }
 0x345   : > { %v1009_v24 = vpop.permute.xlu1 %1008  ;;  %v1007_v26 = vpop.permute.xlu0 %1006  ;;  %v1037_v29 = vsub.f32 %v1017_v22, %v1030_v57  ;;  %v771_v5 = vmax.f32 %v769_v18, 0.0 }
 0x346   : > { %v1012_v31 = vsel %vm874_vm11, %v1007_v26, %v1009_v24  ;;  %v798_v26 = vadd.f32 %v797_v33, %v796_v21 }
 0x347   : > { %v1018_v61 = vadd.f32 %v1012_v31, %v985_v28  ;;  %v1040_v34 = vand.u32 2147483647, %v1037_v29  ;;  %v773_v8 = vmin.f32 %v771_v5, 1.0  ;;  %v814_v29 = vand.u32 2147483647, %v812_v36 }
 0x349   : > { %v1082_v38 = vpop.permute.xlu1 %1081  ;;  %v1038_v39 = vsub.f32 %v1018_v61, %v1032_v63  ;;  %v1047_v37 = vrot.slane %v1040_v34, 7  ;;  %v1080_v40 = vpop.permute.xlu0 %1079  ;;  %v768_v63 = vmul.f32 0.713, %v766_v41  ;;  %v830_v17 = vsub.f32 %v773_v8, %v828_v32 }
 0x34a   : > { %v1088_v44 = vsub.f32 %v1018_v61, %v1082_v38  ;;  %v1087_v47 = vsub.f32 %v1017_v22, %v1080_v40  ;;  %v811_v22 = vsub.f32 %v783_v15, %v809_v19 }
 0x34b   : > { %v1041_v48 = vand.u32 2147483647, %v1038_v39  ;;  %v1048_v49 = vsel %vm1045_vm12, %v1046_v35, %v1047_v37  ;;  %v770_v54 = vadd.f32 0.5, %v768_v63  ;;  %v832_v23 = vand.u32 2147483647, %v830_v17 }
 0x34c   : > { %v1091_v3 = vand.u32 2147483647, %v1088_v44  ;;  %v1090_v50 = vand.u32 2147483647, %v1087_v47  ;;  %1051 = vrot.lane.b32.xlu0 %v1048_v49, %s1685_s19  ;;  %v813_v28 = vand.u32 2147483647, %v811_v22  ;;  %v1118_v17 = vlaneseq }
 0x34d   : > { %v1049_v51 = vrot.slane %v1041_v48, 7  ;;  %v772_v45 = vmax.f32 %v770_v54, 0.0  ;;  %v834_v30 = vsel %vm795_vm8, %v832_v23, 0.0  ;;  %v816_v35 = vsel %vm795_vm8, %v814_v29, 0.0 }
 0x34e   : > { %v1096_v53 = vrot.slane %v1090_v50, 7  ;;  %v1098_v55 = vrot.slane %v1091_v3, 7  ;;  %v815_v34 = vsel %vm795_vm8, %v813_v28, 0.0 }
 0x34f   : > { %v1050_v56 = vsel %vm1045_vm12, %v1047_v37, %v1049_v51  ;;  %v774_v20 = vmin.f32 %v772_v45, 1.0  ;;  %v817_v38 = vadd.f32 %v816_v35, %v815_v34 }
 0x350   : > { %1053 = vrot.lane.b32.xlu1 %v1050_v56, %s1685_s19  ;;  %v1097_v57 = vsel %vm1045_vm12, %v1095_v52, %v1096_v53  ;;  %v1099_v60 = vsel %vm1045_vm12, %v1096_v53, %v1098_v55 }
 0x351   : > { %1100 = vrot.lane.b32.xlu0 %v1097_v57, %s1685_s19  ;;  %v831_v42 = vsub.f32 %v774_v20, %v829_v9 }
 0x353   : > { %v833_v24 = vand.u32 2147483647, %v831_v42  ;;  %v1119_v42 = vshrl.u32 %v1118_v17, 7 }
 0x354   : > { %1102 = vrot.lane.b32.xlu1 %v1099_v60, %s1685_s19  ;;  %s1688_s19 = smov [#allocation10]  }
 0x355   : > { %v835_v31 = vsel %vm795_vm8, %v833_v24, 0.0  ;;  %vm1120_vm13 = vcmp.eq.s32.totalorder %v1119_v42, 0  ;;  %vm1123_vm14 = vcmp.eq.s32.totalorder %v1119_v42, 1  ;;  %vm1126_vm15 = vcmp.eq.s32.totalorder %v1119_v42, 2  ;;  %s1551_s27 = sshll.u32 %s1688_s19, 4  ;;  %s1552_s27 = int_to_ptr.vmem [resolvable:$false] %s1551_s27 }
 0x356   : > { %v836_v61 = vadd.f32 %v835_v31, %v834_v30  ;;  %vm1129_vm0 = vcmp.eq.s32.totalorder %v1119_v42, 3  ;;  %vm1132_vm1 = vcmp.eq.s32.totalorder %v1119_v42, 4  ;;  %s1553_s5 = scalar_lea.vmem %s1552_s27, 256  ;;  %p1554_p12 = scmp.lt.s32.totalorder %s2336_s9, %s1552_s27 }
 0x357   : > { %p1555_p2 = scmp.lt.s32.totalorder %s1553_s5, %s1547_s28 }
 0x359   : > { %p1556_p11 = por %p1555_p2, %p1554_p12 }
 0x35b   : > { %p1557_p13 = pnand %p1556_p11, %p1550_p3 }
 0x370   : > { %799 = vadd.xlane.f32.xlu0 %v798_v26 }
 0x374   : > { %837 = vadd.xlane.f32.xlu0 %v836_v61 }
 0x378   : > { %818 = vadd.xlane.f32.xlu1 %v817_v38 }
 0x3be   : > { %v1052_v39 = vpop.permute.xlu0 %1051 }
 0x3bf   : > { %v1057_v40 = vsel %vm795_vm8, %v1052_v39, 0.0 }
 0x3c2   : > { %v1054_v37 = vpop.permute.xlu1 %1053 }
 0x3c3   : > { %v1058_v43 = vsel %vm795_vm8, %v1054_v37, 0.0  ;;  %v1101_v44 = vpop.permute.xlu0 %1100 }
 0x3c4   : > { %v1059_v47 = vadd.f32 %v1058_v43, %v1057_v40  ;;  %v1106_v49 = vsel %vm795_vm8, %v1101_v44, 0.0 }
 0x3c6   : > { %v1103_v48 = vpop.permute.xlu1 %1102  ;;  %1060 = vadd.xlane.f32.xlu0 %v1059_v47 }
 0x3c7   : > { %v1107_v3 = vsel %vm795_vm8, %v1103_v48, 0.0 }
 0x3c8   : > { %v1108_v50 = vadd.f32 %v1107_v3, %v1106_v49 }
 0x3ca   : > { %1109 = vadd.xlane.f32.xlu1 %v1108_v50 }
 0x3fd   : > { %v800_v51 = vpop.xlane.xlu0 %799 }
 0x3fe   : > { %v801_v52 = vrot.slane %v800_v51, 4 }
 0x400   : > { %v802_v53 = vadd.f32 %v801_v52, %v800_v51 }
 0x401   : > { %v838_v55 = vpop.xlane.xlu0 %837 }
 0x402   : > { %v803_v56 = vrot.slane %v802_v53, 2  ;;  %v839_v57 = vrot.slane %v838_v55, 4 }
 0x404   : > { %v840_v59 = vadd.f32 %v839_v57, %v838_v55  ;;  %v804_v41 = vadd.f32 %v803_v56, %v802_v53 }
 0x405   : > { %v819_v60 = vpop.xlane.xlu1 %818 }
 0x406   : > { %v820_v62 = vrot.slane %v819_v60, 4  ;;  %v841_v46 = vrot.slane %v840_v59, 2  ;;  %v805_v11 = vrot.slane %v804_v41, 1 }
 0x408   : > { %v821_v63 = vadd.f32 %v820_v62, %v819_v60  ;;  %v806_v0 = vadd.f32 %v805_v11, %v804_v41  ;;  %v842_v1 = vadd.f32 %v841_v46, %v840_v59 }
 0x40a   : > { %v822_v18 = vrot.slane %v821_v63, 2  ;;  %1305 = vpush %v806_v0  ;;  %v843_v54 = vrot.slane %v842_v1, 1 }
 0x40c   : > { %v823_v12 = vadd.f32 %v822_v18, %v821_v63  ;;  %v844_v2 = vadd.f32 %v843_v54, %v842_v1 }
 0x40e   : > { %v824_v58 = vrot.slane %v823_v12, 1 }
 0x410   : > { %v825_v25 = vadd.f32 %v824_v58, %v823_v12 }
 0x412   : > { %1307 = vpush %v825_v25 }
 0x413   : > { %1309 = vpush %v844_v2 }
 0x43b   : > { %s1306_s3 = spop %1305 }
 0x43c   : > { %v1121_v19 = vstv %s1306_s3 }
 0x43d   : > { %v1122_v4 = vsel %vm1120_vm13, %v1121_v19, 0.0 }
 0x443   : > { %s1308_s14 = spop %1307 }
 0x444   : > { %v1124_v21 = vstv %s1308_s14  ;;  %s1310_s29 = spop %1309 }
 0x445   : > { %v1125_v33 = vsel %vm1123_vm14, %v1124_v21, %v1122_v4  ;;  %v1127_v22 = vstv %s1310_s29 }
 0x446   : > { %v1128_v23 = vsel %vm1126_vm15, %v1127_v22, %v1125_v33 }
 0x453   : > { %v1061_v5 = vpop.xlane.xlu0 %1060 }
 0x454   : > { %v1062_v45 = vrot.slane %v1061_v5, 4 }
 0x456   : > { %v1063_v6 = vadd.f32 %v1062_v45, %v1061_v5 }
 0x457   : > { %v1110_v7 = vpop.xlane.xlu1 %1109 }
 0x458   : > { %v1064_v14 = vrot.slane %v1063_v6, 2  ;;  %v1111_v27 = vrot.slane %v1110_v7, 4 }
 0x45a   : > { %v1065_v8 = vadd.f32 %v1064_v14, %v1063_v6  ;;  %v1112_v20 = vadd.f32 %v1111_v27, %v1110_v7 }
 0x45c   : > { %v1113_v32 = vrot.slane %v1112_v20, 2  ;;  %v1066_v9 = vrot.slane %v1065_v8, 1 }
 0x45e   : > { %v1114_v10 = vadd.f32 %v1113_v32, %v1112_v20  ;;  %v1067_v13 = vadd.f32 %v1066_v9, %v1065_v8 }
 0x460   : > { %1311 = vpush %v1067_v13  ;;  %v1115_v15 = vrot.slane %v1114_v10, 1 }
 0x462   : > { %v1116_v16 = vadd.f32 %v1115_v15, %v1114_v10 }
 0x464   : > { %1313 = vpush %v1116_v16 }
 0x491   : > { %s1312_s30 = spop %1311 }
 0x492   : > { %v1130_v36 = vstv %s1312_s30 }
 0x493   : > { %v1131_v24 = vsel %vm1129_vm0, %v1130_v36, %v1128_v23 }
 0x495   : > { %s1314_s23 = spop %1313 }
 0x496   : > { %v1133_v26 = vstv %s1314_s23 }
 0x497   : > { %v1134_v28 = vsel %vm1132_vm1, %v1133_v26, %v1131_v24 }
 0x498   : > { %1135 = vst [vmem:[%s2006_s11] sm:$0xff] %v1134_v28 }
 0x499   : > { %1560 = shalt.err (!%p1557_p13)
}
 0x49a   : > { %s1561_s6 = scalar_lea.hbm %s2334_s1, 128  ;;  %s1565_s10 = scalar_lea.hbm %s2460_s4, 512 }
 0x49b   : > { %p1562_p1 = scmp.ne.s32.totalorder %s2334_s1, %s1561_s6  ;;  %p1566_p9 = scmp.lt.u32.totalorder %s2334_s1, %s2460_s4 }
 0x49c   : > { %p1567_p5 = scmp.lt.u32.totalorder %s1565_s10, %s1561_s6  ;;  %p1569_p8 = scmp.lt.u32.totalorder %s1561_s6, %s2334_s1 }
 0x49d   : > { %p1563_p0 = pnand %p1562_p1, %p2461_p7 }
 0x49e   : > { %p1568_p10 = por %p1567_p5, %p1566_p9 }
 0x49f   : > { %p1564_p4 = pneg %p1563_p0 }
 0x4a0   : > { %p1570_p6 = por %p1569_p8, %p1568_p10 }
 0x4a2   : > { %p1571_p3 = pnand %p1570_p6, %p1564_p4 }
 0x4a4   : > { %1574 = shalt.err (!%p1571_p3)
}
 0x4a5   : > { %1321 = dma.vmem_to_hbm [thread:$0]  (%p2461_p7), %s2336_s9, 128, %s2334_s1, %s1137_s24  }
 0x4a6 PF: > { %p1338_p12 = scmp.ge.s32.totalorder %s1673_s22, 2  ;;  %s1164_s20 = sand.u32 1, %s1645_s15  }
 0x4a7   : > { %p2462_p2 = scmp.ne.s32.totalorder %s2442_s12, 0  ;;  %s1165_s29 = scalar_lea.sflag [#allocation6], %s1164_s20 }
 0x4a9   : > { %p1334_p11 = pnand %p1338_p12, %p2462_p2 }
 0x4ab   : > { %1628 = dma.done.wait (!%p1334_p11), %s1165_s29, 128  }
 0x4ac   : > { %1630 = vsyncadd (!%p1334_p11), %s1165_s29, 4294967168  ;;  %s22_s22 = sadd.s32 1, %s1673_s22   ;;  %s2463_s8 = sld [smem:[#allocation14_spill]] }
 0x4ad   : > { %p19_p13 = scmp.ge.s32.totalorder %s22_s22, 6   ;;  %s2464_s14 = sld [smem:[#allocation22_spill]] }
 0x4ae   : > { %s2465_s26 = sld [smem:[#allocation15_spill]]  ;;  %s2466_s17 = sld [smem:[#allocation23_spill]] }
 0x4af   : > { %s2467_s18 = sld [smem:[#allocation18_spill]]  ;;  %s2468_s20 = sld [smem:[#allocation19_spill]] }
 0x4b0   : > { %s2469_s30 = sld [smem:[#allocation21_spill]]  ;;  %s2470_s12 = smov %s1637_s13 }
 0x4b1   : > { %s2472_s15 = smov %s1649_s16  ;;  %s2474_s19 = smov %s1669_s21 }
 0x4b2   : > { %s2471_s13 = smov %s2463_s8  ;;  %21 = sbr.rel (!%p19_p13) target bundleno = 14 (0xe), region = 113 }
 0x4b4   : > { %s2473_s16 = smov %s2465_s26 }
 0x4b6   : > { %s2475_s21 = smov %s2469_s30 }
 0x4b9   :  { %1170 = vsyncpa [#allocation5], 1 }
 0x4ba   :  { %1172 = vsyncpa [#allocation5 + $0x1], 1 }
 0x4bb   :  { %1173 = vsyncpa [#allocation8], 1 }
 0x4bc   :  { %1175 = vsyncpa [#allocation8 + $0x1], 1 }
 0x4bd   :  { %1176 = vsyncpa [#allocation6], 1 }
 0x4be   :  { %1178 = vsyncpa [#allocation6 + $0x1], 1 }

</bundles_post_ra>
